<compile_context>
chip_gen: v7x
topology: tpu7x:2x2x1
jax: 0.10.0
libtpu: 0.0.40
codegen_flags: <defaults>
</compile_context>

<pallas_src>
import functools

import numpy as np

import jax
import jax.numpy as jnp
from jax.experimental import pallas as pl
from jax.experimental.pallas import tpu as pltpu


def _layer_norm(z, gamma, beta, eps=1e-5):
    mu = jnp.mean(z, axis=-1, keepdims=True)
    var = jnp.mean((z - mu) ** 2, axis=-1, keepdims=True)
    return (z - mu) * jax.lax.rsqrt(var + eps) * gamma + beta


def mab_kernel(x_ref, y_ref,
               wq_ref, bq_ref, wk_ref, bk_ref, wv_ref, bv_ref,
               wo_ref, bo_ref,
               g1_ref, be1_ref,
               wf_ref, bf_ref,
               g2_ref, be2_ref,
               out_ref,
               *, num_heads, n, m, batch_tile, compute_dtype):
    d = x_ref.shape[-1]
    p = d // num_heads
    inv_temp = jnp.float32(1.0 / float(p) ** 0.5)
    use_approx = np.dtype(compute_dtype) != np.dtype(np.float32)

    # Single resident copy of x (f32, needed for the residual); MXU operands are
    # cast inline and consumed immediately by the dot (no second live copy).
    x_f32 = x_ref[...].astype(jnp.float32)           # (Bt*n, d)
    yc = y_ref[...].astype(compute_dtype)             # (Bt*m, d)

    # --- full-width projections: MXU N = K = d, batch rows folded into M ---
    q = (jnp.dot(x_f32.astype(compute_dtype), wq_ref[...],
                 preferred_element_type=jnp.float32) + bq_ref[...]) * inv_temp
    k = jnp.dot(yc, wk_ref[...], preferred_element_type=jnp.float32) + bk_ref[...]
    v = jnp.dot(yc, wv_ref[...], preferred_element_type=jnp.float32) + bv_ref[...]

    qc = q.astype(compute_dtype)                       # (Bt*n, d)
    kc = k.astype(compute_dtype)                       # (Bt*m, d)
    vc = v.astype(compute_dtype)                       # (Bt*m, d)

    # --- attention core: static (unrolled) per-head loop, no carried accumulator ---
    head_outs = []
    for hh in range(num_heads):
        lo, hi = hh * p, (hh + 1) * p
        q3 = qc[:, lo:hi].reshape(batch_tile, n, p)
        k3 = kc[:, lo:hi].reshape(batch_tile, m, p)
        v3 = vc[:, lo:hi].reshape(batch_tile, m, p)

        # scores: contract LAST dims of both operands (no K^T materialized)
        s = jnp.einsum("bnp,bmp->bnm", q3, k3,
                       preferred_element_type=jnp.float32)           # (Bt, n, m)
        s = s - jnp.max(s, axis=-1, keepdims=True)
        e = jnp.exp(s)
        attn = e * pl.reciprocal(jnp.sum(e, axis=-1, keepdims=True),
                                 approx=use_approx)                  # softmax
        o3 = jnp.einsum("bnm,bmp->bnp", attn.astype(compute_dtype), v3,
                        preferred_element_type=jnp.float32)          # (Bt, n, p)
        head_outs.append(o3.reshape(batch_tile * n, p))

    # Heads re-fused along the lane dim -> ONE full-width output projection.
    o = jnp.concatenate(head_outs, axis=-1).astype(compute_dtype)     # (Bt*n, d)
    mha = jnp.dot(o, wo_ref[...], preferred_element_type=jnp.float32) + bo_ref[...]

    # --- residual + LayerNorm1 ---
    h1 = _layer_norm(x_f32 + mha, g1_ref[...], be1_ref[...])

    # --- row-wise feed-forward: Linear(d, d) + ReLU (batch rows folded) ---
    ff = jnp.dot(h1.astype(compute_dtype), wf_ref[...],
                 preferred_element_type=jnp.float32) + bf_ref[...]
    ff = jnp.maximum(ff, 0.0)

    # --- residual + LayerNorm2 ---
    out_ref[...] = _layer_norm(h1 + ff, g2_ref[...], be2_ref[...]).astype(out_ref.dtype)


def _estimate_step_vmem_bytes(block_b, n, m, d, h, in_itemsize, cd_itemsize):
    rows_x, rows_y = block_b * n, block_b * m
    # Pipelined activation tiles (x, y inputs + output), double-buffered.
    act = 2 * (2 * rows_x * d + rows_y * d) * in_itemsize
    # Weights: 5 (d,d) matrices in compute dtype + biases / LN params (single copy).
    wts = 5 * d * d * cd_itemsize + 12 * d * 4
    # Live f32 intermediates: q/k/v, per-head scores+probs (all heads as the
    # unrolled-loop worst case), fused head output, h1, ff.
    inter = 4 * (rows_x * d + 2 * rows_y * d
                 + 2 * block_b * h * n * m
                 + 3 * rows_x * d)
    return act + wts + inter


def _choose_block_b(b, n, m, d, h, in_dtype, compute_dtype, vmem_budget):
    in_sz = np.dtype(in_dtype).itemsize
    cd_sz = np.dtype(compute_dtype).itemsize
    min_sub = max(8, 32 // in_sz)              # f32 -> 8 sublanes, bf16 -> 16, int8 -> 32
    divisors = [c for c in range(1, b + 1) if b % c == 0]

    def aligned(bb):                           # (8,128)-rule on partial row blocks
        return bb == b or ((bb * n) % min_sub == 0 and (bb * m) % min_sub == 0)

    def fits(bb):
        return _estimate_step_vmem_bytes(bb, n, m, d, h, in_sz, cd_sz) <= vmem_budget

    # Largest batch tile that fits the budget and still leaves >= 2 grid steps
    # (keeps DMA/compute pipelining and lets megacore shard the parallel axis).
    best = None
    for bb in divisors:
        if aligned(bb) and fits(bb) and b // bb >= 2:
            best = bb
    if best is not None:
        return best
    # Otherwise: largest aligned tile that fits (possibly the whole batch).
    for bb in reversed(divisors):
        if aligned(bb) and fits(bb):
            return bb
    return b


def mab_forward(x, y, params, *, num_heads, compute_dtype=jnp.bfloat16, block_b=None):
    (wq, bq, wk, bk, wv, bv, wo, bo,
     g1, be1, w_rff, b_rff, g2, be2) = params
    b, n, d = x.shape
    _, m, _ = y.shape
    assert d % num_heads == 0, "d must be divisible by num_heads"
    h = num_heads
    cd = compute_dtype
    f32 = jnp.float32

    # --- generation-aware VMEM budget (v5e/v6e: 128 MiB, v7x: 64 MiB) ---
    try:
        vmem_cap = int(pltpu.get_tpu_info().vmem_capacity_bytes)
    except Exception:
        vmem_cap = 64 * 1024 * 1024            # conservative (v7x) fallback
    vmem_limit = min(int(vmem_cap * 3 // 4), 110 * 1024 * 1024)

    if block_b is None:
        block_b = _choose_block_b(b, n, m, d, h, x.dtype, cd, vmem_limit)
    assert b % block_b == 0
    if block_b != b:
        min_sub = max(8, 32 // np.dtype(x.dtype).itemsize)
        assert (block_b * n) % min_sub == 0 and (block_b * m) % min_sub == 0

    # One-time parameter layout / casts (MXU operands in compute dtype).
    wq_c, wk_c, wv_c = wq.astype(cd), wk.astype(cd), wv.astype(cd)
    wo_c, wf_c = wo.astype(cd), w_rff.astype(cd)
    bq_r = bq.reshape(1, d).astype(f32)
    bk_r = bk.reshape(1, d).astype(f32)
    bv_r = bv.reshape(1, d).astype(f32)
    bo_r = bo.reshape(1, d).astype(f32)
    bf_r = b_rff.reshape(1, d).astype(f32)
    g1_r, be1_r = g1.reshape(1, d).astype(f32), be1.reshape(1, d).astype(f32)
    g2_r, be2_r = g2.reshape(1, d).astype(f32), be2.reshape(1, d).astype(f32)

    # Fold batch into the row (sublane / MXU-M) dimension.
    xf = x.reshape(b * n, d)
    yf = y.reshape(b * m, d)
    rows_x, rows_y = block_b * n, block_b * m
    grid = (b // block_b,)

    def _in_specs(single_buffer_weights):
        if single_buffer_weights:
            def wspec(shape):
                zeros = (0,) * len(shape)
                # Grid-invariant blocks: a single VMEM copy is enough.
                return pl.BlockSpec(shape, lambda i, _z=zeros: _z,
                                    pipeline_mode=pl.Buffered(1))
        else:
            def wspec(shape):
                zeros = (0,) * len(shape)
                return pl.BlockSpec(shape, lambda i, _z=zeros: _z)
        return [
            pl.BlockSpec((rows_x, d), lambda i: (i, 0)),   # x rows
            pl.BlockSpec((rows_y, d), lambda i: (i, 0)),   # y rows
            wspec((d, d)), wspec((1, d)),                  # Wq, bq
            wspec((d, d)), wspec((1, d)),                  # Wk, bk
            wspec((d, d)), wspec((1, d)),                  # Wv, bv
            wspec((d, d)), wspec((1, d)),                  # Wo, bo
            wspec((1, d)), wspec((1, d)),                  # LN1 gamma, beta
            wspec((d, d)), wspec((1, d)),                  # rFF W, b
            wspec((1, d)), wspec((1, d)),                  # LN2 gamma, beta
        ]

    in_sz = np.dtype(x.dtype).itemsize
    cd_sz = np.dtype(cd).itemsize
    flops = int(2 * b * d * d * (3 * n + 2 * m) + 4 * b * n * m * d)
    transcendentals = int(b * h * n * m + 4 * b * n)
    bytes_accessed = int(in_sz * (2 * b * n * d + b * m * d)
                         + cd_sz * 5 * d * d + 4 * 12 * d)

    kernel = functools.partial(mab_kernel, num_heads=h, n=n, m=m,
                               batch_tile=block_b, compute_dtype=cd)

    def _run(single_buffer_weights):
        return pl.pallas_call(
            kernel,
            out_shape=jax.ShapeDtypeStruct((b * n, d), x.dtype),
            grid=grid,
            in_specs=_in_specs(single_buffer_weights),
            out_specs=pl.BlockSpec((rows_x, d), lambda i: (i, 0)),
            compiler_params=pltpu.CompilerParams(
                dimension_semantics=("parallel",),
                vmem_limit_bytes=vmem_limit),
            cost_estimate=pl.CostEstimate(flops=flops,
                                          transcendentals=transcendentals,
                                          bytes_accessed=bytes_accessed),
        )(xf, yf, wq_c, bq_r, wk_c, bk_r, wv_c, bv_r, wo_c, bo_r,
          g1_r, be1_r, wf_c, bf_r, g2_r, be2_r)

    try:
        out = _run(True)
        jax.block_until_ready(out)
    except Exception:
        # TODO(synk): this jax build rejected pipeline_mode=pl.Buffered(1) for the
        # grid-invariant weight blocks; fall back to default double-buffering.
        out = _run(False)
    return out.reshape(b, n, d)


# ---------------- pure-JAX reference (mirrors the PyTorch forward) ----------------
def mab_reference(x, y, params, *, num_heads):
    (wq, bq, wk, bk, wv, bv, wo, bo,
     g1, be1, w_rff, b_rff, g2, be2) = params
    b, n, d = x.shape
    m = y.shape[1]
    p = d // num_heads

    q = x @ wq + bq
    k = y @ wk + bk
    v = y @ wv + bv

    def split_heads(t, seq):
        return t.reshape(b, seq, num_heads, p).transpose(2, 0, 1, 3).reshape(num_heads * b, seq, p)

    qh, kh, vh = split_heads(q, n), split_heads(k, m), split_heads(v, m)
    attn = jnp.einsum("bnp,bmp->bnm", qh, kh) / (p ** 0.5)
    attn = jax.nn.softmax(attn, axis=2)
    o = jnp.einsum("bnm,bmp->bnp", attn, vh)
    o = o.reshape(num_heads, b, n, p).transpose(1, 2, 0, 3).reshape(b, n, d)
    o = o @ wo + bo

    def ln(z, g, bta, eps=1e-5):
        mu = jnp.mean(z, axis=-1, keepdims=True)
        var = jnp.mean((z - mu) ** 2, axis=-1, keepdims=True)
        return (z - mu) / jnp.sqrt(var + eps) * g + bta

    h1 = ln(x + o, g1, be1)
    ff = jnp.maximum(h1 @ w_rff + b_rff, 0.0)
    return ln(h1 + ff, g2, be2)


if __name__ == "__main__":
    b, n, m, d, heads = 2, 8, 8, 32, 4

    key = jax.random.PRNGKey(0)
    keys = jax.random.split(key, 16)

    def xavier(k, d_in, d_out):
        std = (2.0 / (d_in + d_out)) ** 0.5
        return jax.random.normal(k, (d_in, d_out), jnp.float32) * std

    def small(k):
        return 0.1 * jax.random.normal(k, (1, d), jnp.float32)

    x = jax.random.normal(keys[0], (b, n, d), jnp.float32)
    y = jax.random.normal(keys[1], (b, m, d), jnp.float32)

    params = (
        xavier(keys[2], d, d), small(keys[7]),                  # Wq, bq
        xavier(keys[3], d, d), small(keys[8]),                  # Wk, bk
        xavier(keys[4], d, d), small(keys[9]),                  # Wv, bv
        xavier(keys[5], d, d), small(keys[10]),                 # Wo, bo
        1.0 + 0.1 * jax.random.normal(keys[11], (1, d)), small(keys[12]),  # LN1
        xavier(keys[6], d, d), small(keys[13]),                 # rff W, b
        1.0 + 0.1 * jax.random.normal(keys[14], (1, d)), small(keys[15]),  # LN2
    )

    ref = mab_reference(x, y, params, num_heads=heads)

    # Exact path: f32 MXU operands + exact softmax normalization.
    out_f32 = mab_forward(x, y, params, num_heads=heads, compute_dtype=jnp.float32)
    jax.block_until_ready(out_f32)
    # Fast path (default): bf16 MXU operands, f32 accumulation, approx reciprocal.
    out_bf16 = mab_forward(x, y, params, num_heads=heads, compute_dtype=jnp.bfloat16)
    jax.block_until_ready(out_bf16)

    assert out_f32.shape == (b, n, d) and out_bf16.shape == (b, n, d)
    err_f32 = float(jnp.max(jnp.abs(out_f32 - ref)))
    err_bf16 = float(jnp.max(jnp.abs(out_bf16 - ref)))
    assert err_f32 < 1e-3, f"f32 path max abs err {err_f32}"
    assert err_bf16 < 1e-1, f"bf16 path max abs err {err_bf16}"

    print("KERNEL_OK")
</pallas_src>

<mosaic_0001>
module attributes {stable_mosaic.version = 11 : i64} {
  func.func @mab_kernel(%arg0: i32, %arg1: memref<8x32xf32, #tpu.memory_space<vmem>>, %arg2: memref<8x32xf32, #tpu.memory_space<vmem>>, %arg3: memref<32x32xf32, #tpu.memory_space<vmem>>, %arg4: memref<1x32xf32, #tpu.memory_space<vmem>>, %arg5: memref<32x32xf32, #tpu.memory_space<vmem>>, %arg6: memref<1x32xf32, #tpu.memory_space<vmem>>, %arg7: memref<32x32xf32, #tpu.memory_space<vmem>>, %arg8: memref<1x32xf32, #tpu.memory_space<vmem>>, %arg9: memref<32x32xf32, #tpu.memory_space<vmem>>, %arg10: memref<1x32xf32, #tpu.memory_space<vmem>>, %arg11: memref<1x32xf32, #tpu.memory_space<vmem>>, %arg12: memref<1x32xf32, #tpu.memory_space<vmem>>, %arg13: memref<32x32xf32, #tpu.memory_space<vmem>>, %arg14: memref<1x32xf32, #tpu.memory_space<vmem>>, %arg15: memref<1x32xf32, #tpu.memory_space<vmem>>, %arg16: memref<1x32xf32, #tpu.memory_space<vmem>>, %arg17: memref<8x32xf32, #tpu.memory_space<vmem>>) attributes {dimension_semantics = [#tpu.dimension_semantics<parallel>], iteration_bounds = array<i64: 2>, scalar_prefetch = 0 : i64, scratch_operands = 0 : i64, tpu.core_type = #tpu.core_type<tc>, window_params = [{transform_indices = @transform_0, window_bounds = array<i64: 8, 32>}, {transform_indices = @transform_1, window_bounds = array<i64: 8, 32>}, {pipeline_mode = #tpu.pipeline_mode<synchronous>, transform_indices = @transform_2, window_bounds = array<i64: 32, 32>}, {pipeline_mode = #tpu.pipeline_mode<synchronous>, transform_indices = @transform_3, window_bounds = array<i64: 1, 32>}, {pipeline_mode = #tpu.pipeline_mode<synchronous>, transform_indices = @transform_4, window_bounds = array<i64: 32, 32>}, {pipeline_mode = #tpu.pipeline_mode<synchronous>, transform_indices = @transform_5, window_bounds = array<i64: 1, 32>}, {pipeline_mode = #tpu.pipeline_mode<synchronous>, transform_indices = @transform_6, window_bounds = array<i64: 32, 32>}, {pipeline_mode = #tpu.pipeline_mode<synchronous>, transform_indices = @transform_7, window_bounds = array<i64: 1, 32>}, {pipeline_mode = #tpu.pipeline_mode<synchronous>, transform_indices = @transform_8, window_bounds = array<i64: 32, 32>}, {pipeline_mode = #tpu.pipeline_mode<synchronous>, transform_indices = @transform_9, window_bounds = array<i64: 1, 32>}, {pipeline_mode = #tpu.pipeline_mode<synchronous>, transform_indices = @transform_10, window_bounds = array<i64: 1, 32>}, {pipeline_mode = #tpu.pipeline_mode<synchronous>, transform_indices = @transform_11, window_bounds = array<i64: 1, 32>}, {pipeline_mode = #tpu.pipeline_mode<synchronous>, transform_indices = @transform_12, window_bounds = array<i64: 32, 32>}, {pipeline_mode = #tpu.pipeline_mode<synchronous>, transform_indices = @transform_13, window_bounds = array<i64: 1, 32>}, {pipeline_mode = #tpu.pipeline_mode<synchronous>, transform_indices = @transform_14, window_bounds = array<i64: 1, 32>}, {pipeline_mode = #tpu.pipeline_mode<synchronous>, transform_indices = @transform_15, window_bounds = array<i64: 1, 32>}, {transform_indices = @transform_16, window_bounds = array<i64: 8, 32>}]} {
    %c0 = arith.constant 0 : index
    %c0_0 = arith.constant 0 : index
    %0 = vector.load %arg1[%c0, %c0_0] : memref<8x32xf32, #tpu.memory_space<vmem>>, vector<8x32xf32>
    %c0_1 = arith.constant 0 : index
    %c0_2 = arith.constant 0 : index
    %1 = vector.load %arg2[%c0_1, %c0_2] : memref<8x32xf32, #tpu.memory_space<vmem>>, vector<8x32xf32>
    %c0_3 = arith.constant 0 : index
    %c0_4 = arith.constant 0 : index
    %2 = vector.load %arg3[%c0_3, %c0_4] : memref<32x32xf32, #tpu.memory_space<vmem>>, vector<32x32xf32>
    %cst = arith.constant dense<0.000000e+00> : vector<8x32xf32>
    %3 = tpu.matmul %0, %2, %cst {dimension_numbers = #tpu.dot_dimension_numbers<[1], [0], [0], [1], [0, 0, 1, 1], [], []>} : vector<8x32xf32>, vector<32x32xf32>, vector<8x32xf32> -> vector<8x32xf32>
    %c0_5 = arith.constant 0 : index
    %c0_6 = arith.constant 0 : index
    %4 = vector.load %arg4[%c0_5, %c0_6] : memref<1x32xf32, #tpu.memory_space<vmem>>, vector<1x32xf32>
    %5 = vector.broadcast %4 : vector<1x32xf32> to vector<8x32xf32>
    %6 = arith.addf %3, %5 : vector<8x32xf32>
    %cst_7 = arith.constant 0.353553385 : f32
    %7 = vector.broadcast %cst_7 : f32 to vector<8x32xf32>
    %8 = arith.mulf %6, %7 : vector<8x32xf32>
    %c0_8 = arith.constant 0 : index
    %c0_9 = arith.constant 0 : index
    %9 = vector.load %arg5[%c0_8, %c0_9] : memref<32x32xf32, #tpu.memory_space<vmem>>, vector<32x32xf32>
    %cst_10 = arith.constant dense<0.000000e+00> : vector<8x32xf32>
    %10 = tpu.matmul %1, %9, %cst_10 {dimension_numbers = #tpu.dot_dimension_numbers<[1], [0], [0], [1], [0, 0, 1, 1], [], []>} : vector<8x32xf32>, vector<32x32xf32>, vector<8x32xf32> -> vector<8x32xf32>
    %c0_11 = arith.constant 0 : index
    %c0_12 = arith.constant 0 : index
    %11 = vector.load %arg6[%c0_11, %c0_12] : memref<1x32xf32, #tpu.memory_space<vmem>>, vector<1x32xf32>
    %12 = vector.broadcast %11 : vector<1x32xf32> to vector<8x32xf32>
    %13 = arith.addf %10, %12 : vector<8x32xf32>
    %c0_13 = arith.constant 0 : index
    %c0_14 = arith.constant 0 : index
    %14 = vector.load %arg7[%c0_13, %c0_14] : memref<32x32xf32, #tpu.memory_space<vmem>>, vector<32x32xf32>
    %cst_15 = arith.constant dense<0.000000e+00> : vector<8x32xf32>
    %15 = tpu.matmul %1, %14, %cst_15 {dimension_numbers = #tpu.dot_dimension_numbers<[1], [0], [0], [1], [0, 0, 1, 1], [], []>} : vector<8x32xf32>, vector<32x32xf32>, vector<8x32xf32> -> vector<8x32xf32>
    %c0_16 = arith.constant 0 : index
    %c0_17 = arith.constant 0 : index
    %16 = vector.load %arg8[%c0_16, %c0_17] : memref<1x32xf32, #tpu.memory_space<vmem>>, vector<1x32xf32>
    %17 = vector.broadcast %16 : vector<1x32xf32> to vector<8x32xf32>
    %18 = arith.addf %15, %17 : vector<8x32xf32>
    %19 = vector.extract_strided_slice %8 {offsets = [0, 0], sizes = [8, 8], strides = [1, 1]} : vector<8x32xf32> to vector<8x8xf32>
    %20 = vector.shape_cast %19 : vector<8x8xf32> to vector<1x8x8xf32>
    %21 = vector.extract_strided_slice %13 {offsets = [0, 0], sizes = [8, 8], strides = [1, 1]} : vector<8x32xf32> to vector<8x8xf32>
    %22 = vector.shape_cast %21 : vector<8x8xf32> to vector<1x8x8xf32>
    %23 = vector.extract_strided_slice %18 {offsets = [0, 0], sizes = [8, 8], strides = [1, 1]} : vector<8x32xf32> to vector<8x8xf32>
    %24 = vector.shape_cast %23 : vector<8x8xf32> to vector<1x8x8xf32>
    "tpu.trace_start"() <{level = 10 : i32, message = "bnp,bmp->bnm"}> : () -> ()
    %cst_18 = arith.constant dense<0.000000e+00> : vector<1x8x8xf32>
    %25 = tpu.matmul %20, %22, %cst_18 {dimension_numbers = #tpu.dot_dimension_numbers<[2], [2], [1], [1], [0, 0, 0, 1, 1, 1], [0], [0]>} : vector<1x8x8xf32>, vector<1x8x8xf32>, vector<1x8x8xf32> -> vector<1x8x8xf32>
    "tpu.trace_stop"() : () -> ()
    %cst_19 = arith.constant dense<0xFF800000> : vector<1x8xf32>
    %26 = vector.multi_reduction <maximumf>, %25, %cst_19 [2] : vector<1x8x8xf32> to vector<1x8xf32>
    %27 = vector.shape_cast %26 : vector<1x8xf32> to vector<1x8x1xf32>
    %28 = vector.broadcast %27 : vector<1x8x1xf32> to vector<1x8x8xf32>
    %29 = arith.subf %25, %28 : vector<1x8x8xf32>
    %30 = math.exp %29 : vector<1x8x8xf32>
    %cst_20 = arith.constant dense<0.000000e+00> : vector<1x8xf32>
    %31 = vector.multi_reduction <add>, %30, %cst_20 [2] : vector<1x8x8xf32> to vector<1x8xf32>
    %32 = vector.shape_cast %31 : vector<1x8xf32> to vector<1x8x1xf32>
    %33 = tpu.reciprocal %32 : vector<1x8x1xf32> -> vector<1x8x1xf32>
    %34 = vector.broadcast %33 : vector<1x8x1xf32> to vector<1x8x8xf32>
    %35 = arith.mulf %30, %34 : vector<1x8x8xf32>
    "tpu.trace_start"() <{level = 10 : i32, message = "bnm,bmp->bnp"}> : () -> ()
    %cst_21 = arith.constant dense<0.000000e+00> : vector<1x8x8xf32>
    %36 = tpu.matmul %35, %24, %cst_21 {dimension_numbers = #tpu.dot_dimension_numbers<[2], [1], [1], [2], [0, 0, 0, 1, 1, 2], [0], [0]>} : vector<1x8x8xf32>, vector<1x8x8xf32>, vector<1x8x8xf32> -> vector<1x8x8xf32>
    "tpu.trace_stop"() : () -> ()
    %37 = vector.shape_cast %36 : vector<1x8x8xf32> to vector<8x8xf32>
    %38 = vector.extract_strided_slice %8 {offsets = [0, 8], sizes = [8, 8], strides = [1, 1]} : vector<8x32xf32> to vector<8x8xf32>
    %39 = vector.shape_cast %38 : vector<8x8xf32> to vector<1x8x8xf32>
    %40 = vector.extract_strided_slice %13 {offsets = [0, 8], sizes = [8, 8], strides = [1, 1]} : vector<8x32xf32> to vector<8x8xf32>
    %41 = vector.shape_cast %40 : vector<8x8xf32> to vector<1x8x8xf32>
    %42 = vector.extract_strided_slice %18 {offsets = [0, 8], sizes = [8, 8], strides = [1, 1]} : vector<8x32xf32> to vector<8x8xf32>
    %43 = vector.shape_cast %42 : vector<8x8xf32> to vector<1x8x8xf32>
    "tpu.trace_start"() <{level = 10 : i32, message = "bnp,bmp->bnm"}> : () -> ()
    %cst_22 = arith.constant dense<0.000000e+00> : vector<1x8x8xf32>
    %44 = tpu.matmul %39, %41, %cst_22 {dimension_numbers = #tpu.dot_dimension_numbers<[2], [2], [1], [1], [0, 0, 0, 1, 1, 1], [0], [0]>} : vector<1x8x8xf32>, vector<1x8x8xf32>, vector<1x8x8xf32> -> vector<1x8x8xf32>
    "tpu.trace_stop"() : () -> ()
    %cst_23 = arith.constant dense<0xFF800000> : vector<1x8xf32>
    %45 = vector.multi_reduction <maximumf>, %44, %cst_23 [2] : vector<1x8x8xf32> to vector<1x8xf32>
    %46 = vector.shape_cast %45 : vector<1x8xf32> to vector<1x8x1xf32>
    %47 = vector.broadcast %46 : vector<1x8x1xf32> to vector<1x8x8xf32>
    %48 = arith.subf %44, %47 : vector<1x8x8xf32>
    %49 = math.exp %48 : vector<1x8x8xf32>
    %cst_24 = arith.constant dense<0.000000e+00> : vector<1x8xf32>
    %50 = vector.multi_reduction <add>, %49, %cst_24 [2] : vector<1x8x8xf32> to vector<1x8xf32>
    %51 = vector.shape_cast %50 : vector<1x8xf32> to vector<1x8x1xf32>
    %52 = tpu.reciprocal %51 : vector<1x8x1xf32> -> vector<1x8x1xf32>
    %53 = vector.broadcast %52 : vector<1x8x1xf32> to vector<1x8x8xf32>
    %54 = arith.mulf %49, %53 : vector<1x8x8xf32>
    "tpu.trace_start"() <{level = 10 : i32, message = "bnm,bmp->bnp"}> : () -> ()
    %cst_25 = arith.constant dense<0.000000e+00> : vector<1x8x8xf32>
    %55 = tpu.matmul %54, %43, %cst_25 {dimension_numbers = #tpu.dot_dimension_numbers<[2], [1], [1], [2], [0, 0, 0, 1, 1, 2], [0], [0]>} : vector<1x8x8xf32>, vector<1x8x8xf32>, vector<1x8x8xf32> -> vector<1x8x8xf32>
    "tpu.trace_stop"() : () -> ()
    %56 = vector.shape_cast %55 : vector<1x8x8xf32> to vector<8x8xf32>
    %57 = vector.extract_strided_slice %8 {offsets = [0, 16], sizes = [8, 8], strides = [1, 1]} : vector<8x32xf32> to vector<8x8xf32>
    %58 = vector.shape_cast %57 : vector<8x8xf32> to vector<1x8x8xf32>
    %59 = vector.extract_strided_slice %13 {offsets = [0, 16], sizes = [8, 8], strides = [1, 1]} : vector<8x32xf32> to vector<8x8xf32>
    %60 = vector.shape_cast %59 : vector<8x8xf32> to vector<1x8x8xf32>
    %61 = vector.extract_strided_slice %18 {offsets = [0, 16], sizes = [8, 8], strides = [1, 1]} : vector<8x32xf32> to vector<8x8xf32>
    %62 = vector.shape_cast %61 : vector<8x8xf32> to vector<1x8x8xf32>
    "tpu.trace_start"() <{level = 10 : i32, message = "bnp,bmp->bnm"}> : () -> ()
    %cst_26 = arith.constant dense<0.000000e+00> : vector<1x8x8xf32>
    %63 = tpu.matmul %58, %60, %cst_26 {dimension_numbers = #tpu.dot_dimension_numbers<[2], [2], [1], [1], [0, 0, 0, 1, 1, 1], [0], [0]>} : vector<1x8x8xf32>, vector<1x8x8xf32>, vector<1x8x8xf32> -> vector<1x8x8xf32>
    "tpu.trace_stop"() : () -> ()
    %cst_27 = arith.constant dense<0xFF800000> : vector<1x8xf32>
    %64 = vector.multi_reduction <maximumf>, %63, %cst_27 [2] : vector<1x8x8xf32> to vector<1x8xf32>
    %65 = vector.shape_cast %64 : vector<1x8xf32> to vector<1x8x1xf32>
    %66 = vector.broadcast %65 : vector<1x8x1xf32> to vector<1x8x8xf32>
    %67 = arith.subf %63, %66 : vector<1x8x8xf32>
    %68 = math.exp %67 : vector<1x8x8xf32>
    %cst_28 = arith.constant dense<0.000000e+00> : vector<1x8xf32>
    %69 = vector.multi_reduction <add>, %68, %cst_28 [2] : vector<1x8x8xf32> to vector<1x8xf32>
    %70 = vector.shape_cast %69 : vector<1x8xf32> to vector<1x8x1xf32>
    %71 = tpu.reciprocal %70 : vector<1x8x1xf32> -> vector<1x8x1xf32>
    %72 = vector.broadcast %71 : vector<1x8x1xf32> to vector<1x8x8xf32>
    %73 = arith.mulf %68, %72 : vector<1x8x8xf32>
    "tpu.trace_start"() <{level = 10 : i32, message = "bnm,bmp->bnp"}> : () -> ()
    %cst_29 = arith.constant dense<0.000000e+00> : vector<1x8x8xf32>
    %74 = tpu.matmul %73, %62, %cst_29 {dimension_numbers = #tpu.dot_dimension_numbers<[2], [1], [1], [2], [0, 0, 0, 1, 1, 2], [0], [0]>} : vector<1x8x8xf32>, vector<1x8x8xf32>, vector<1x8x8xf32> -> vector<1x8x8xf32>
    "tpu.trace_stop"() : () -> ()
    %75 = vector.shape_cast %74 : vector<1x8x8xf32> to vector<8x8xf32>
    %76 = vector.extract_strided_slice %8 {offsets = [0, 24], sizes = [8, 8], strides = [1, 1]} : vector<8x32xf32> to vector<8x8xf32>
    %77 = vector.shape_cast %76 : vector<8x8xf32> to vector<1x8x8xf32>
    %78 = vector.extract_strided_slice %13 {offsets = [0, 24], sizes = [8, 8], strides = [1, 1]} : vector<8x32xf32> to vector<8x8xf32>
    %79 = vector.shape_cast %78 : vector<8x8xf32> to vector<1x8x8xf32>
    %80 = vector.extract_strided_slice %18 {offsets = [0, 24], sizes = [8, 8], strides = [1, 1]} : vector<8x32xf32> to vector<8x8xf32>
    %81 = vector.shape_cast %80 : vector<8x8xf32> to vector<1x8x8xf32>
    "tpu.trace_start"() <{level = 10 : i32, message = "bnp,bmp->bnm"}> : () -> ()
    %cst_30 = arith.constant dense<0.000000e+00> : vector<1x8x8xf32>
    %82 = tpu.matmul %77, %79, %cst_30 {dimension_numbers = #tpu.dot_dimension_numbers<[2], [2], [1], [1], [0, 0, 0, 1, 1, 1], [0], [0]>} : vector<1x8x8xf32>, vector<1x8x8xf32>, vector<1x8x8xf32> -> vector<1x8x8xf32>
    "tpu.trace_stop"() : () -> ()
    %cst_31 = arith.constant dense<0xFF800000> : vector<1x8xf32>
    %83 = vector.multi_reduction <maximumf>, %82, %cst_31 [2] : vector<1x8x8xf32> to vector<1x8xf32>
    %84 = vector.shape_cast %83 : vector<1x8xf32> to vector<1x8x1xf32>
    %85 = vector.broadcast %84 : vector<1x8x1xf32> to vector<1x8x8xf32>
    %86 = arith.subf %82, %85 : vector<1x8x8xf32>
    %87 = math.exp %86 : vector<1x8x8xf32>
    %cst_32 = arith.constant dense<0.000000e+00> : vector<1x8xf32>
    %88 = vector.multi_reduction <add>, %87, %cst_32 [2] : vector<1x8x8xf32> to vector<1x8xf32>
    %89 = vector.shape_cast %88 : vector<1x8xf32> to vector<1x8x1xf32>
    %90 = tpu.reciprocal %89 : vector<1x8x1xf32> -> vector<1x8x1xf32>
    %91 = vector.broadcast %90 : vector<1x8x1xf32> to vector<1x8x8xf32>
    %92 = arith.mulf %87, %91 : vector<1x8x8xf32>
    "tpu.trace_start"() <{level = 10 : i32, message = "bnm,bmp->bnp"}> : () -> ()
    %cst_33 = arith.constant dense<0.000000e+00> : vector<1x8x8xf32>
    %93 = tpu.matmul %92, %81, %cst_33 {dimension_numbers = #tpu.dot_dimension_numbers<[2], [1], [1], [2], [0, 0, 0, 1, 1, 2], [0], [0]>} : vector<1x8x8xf32>, vector<1x8x8xf32>, vector<1x8x8xf32> -> vector<1x8x8xf32>
    "tpu.trace_stop"() : () -> ()
    %94 = vector.shape_cast %93 : vector<1x8x8xf32> to vector<8x8xf32>
    %95 = tpu.concatenate %37, %56, %75, %94 in 1 : vector<8x8xf32>, vector<8x8xf32>, vector<8x8xf32>, vector<8x8xf32> -> vector<8x32xf32>
    %c0_34 = arith.constant 0 : index
    %c0_35 = arith.constant 0 : index
    %96 = vector.load %arg9[%c0_34, %c0_35] : memref<32x32xf32, #tpu.memory_space<vmem>>, vector<32x32xf32>
    %cst_36 = arith.constant dense<0.000000e+00> : vector<8x32xf32>
    %97 = tpu.matmul %95, %96, %cst_36 {dimension_numbers = #tpu.dot_dimension_numbers<[1], [0], [0], [1], [0, 0, 1, 1], [], []>} : vector<8x32xf32>, vector<32x32xf32>, vector<8x32xf32> -> vector<8x32xf32>
    %c0_37 = arith.constant 0 : index
    %c0_38 = arith.constant 0 : index
    %98 = vector.load %arg10[%c0_37, %c0_38] : memref<1x32xf32, #tpu.memory_space<vmem>>, vector<1x32xf32>
    %99 = vector.broadcast %98 : vector<1x32xf32> to vector<8x32xf32>
    %100 = arith.addf %97, %99 : vector<8x32xf32>
    %101 = arith.addf %0, %100 : vector<8x32xf32>
    %c0_39 = arith.constant 0 : index
    %c0_40 = arith.constant 0 : index
    %102 = vector.load %arg11[%c0_39, %c0_40] : memref<1x32xf32, #tpu.memory_space<vmem>>, vector<1x32xf32>
    %c0_41 = arith.constant 0 : index
    %c0_42 = arith.constant 0 : index
    %103 = vector.load %arg12[%c0_41, %c0_42] : memref<1x32xf32, #tpu.memory_space<vmem>>, vector<1x32xf32>
    %cst_43 = arith.constant dense<0.000000e+00> : vector<8xf32>
    %104 = vector.multi_reduction <add>, %101, %cst_43 [1] : vector<8x32xf32> to vector<8xf32>
    %105 = vector.shape_cast %104 : vector<8xf32> to vector<8x1xf32>
    %cst_44 = arith.constant 3.200000e+01 : f32
    %106 = vector.broadcast %cst_44 : f32 to vector<8x1xf32>
    %107 = arith.divf %105, %106 : vector<8x1xf32>
    %108 = vector.broadcast %107 : vector<8x1xf32> to vector<8x32xf32>
    %109 = arith.subf %101, %108 : vector<8x32xf32>
    %110 = arith.mulf %109, %109 : vector<8x32xf32>
    %cst_45 = arith.constant dense<0.000000e+00> : vector<8xf32>
    %111 = vector.multi_reduction <add>, %110, %cst_45 [1] : vector<8x32xf32> to vector<8xf32>
    %112 = vector.shape_cast %111 : vector<8xf32> to vector<8x1xf32>
    %cst_46 = arith.constant 3.200000e+01 : f32
    %113 = vector.broadcast %cst_46 : f32 to vector<8x1xf32>
    %114 = arith.divf %112, %113 : vector<8x1xf32>
    %115 = vector.broadcast %107 : vector<8x1xf32> to vector<8x32xf32>
    %116 = arith.subf %101, %115 : vector<8x32xf32>
    %cst_47 = arith.constant 9.99999974E-6 : f32
    %117 = vector.broadcast %cst_47 : f32 to vector<8x1xf32>
    %118 = arith.addf %114, %117 : vector<8x1xf32>
    %119 = math.rsqrt %118 : vector<8x1xf32>
    %120 = vector.broadcast %119 : vector<8x1xf32> to vector<8x32xf32>
    %121 = arith.mulf %116, %120 : vector<8x32xf32>
    %122 = vector.broadcast %102 : vector<1x32xf32> to vector<8x32xf32>
    %123 = arith.mulf %121, %122 : vector<8x32xf32>
    %124 = vector.broadcast %103 : vector<1x32xf32> to vector<8x32xf32>
    %125 = arith.addf %123, %124 : vector<8x32xf32>
    %c0_48 = arith.constant 0 : index
    %c0_49 = arith.constant 0 : index
    %126 = vector.load %arg13[%c0_48, %c0_49] : memref<32x32xf32, #tpu.memory_space<vmem>>, vector<32x32xf32>
    %cst_50 = arith.constant dense<0.000000e+00> : vector<8x32xf32>
    %127 = tpu.matmul %125, %126, %cst_50 {dimension_numbers = #tpu.dot_dimension_numbers<[1], [0], [0], [1], [0, 0, 1, 1], [], []>} : vector<8x32xf32>, vector<32x32xf32>, vector<8x32xf32> -> vector<8x32xf32>
    %c0_51 = arith.constant 0 : index
    %c0_52 = arith.constant 0 : index
    %128 = vector.load %arg14[%c0_51, %c0_52] : memref<1x32xf32, #tpu.memory_space<vmem>>, vector<1x32xf32>
    %129 = vector.broadcast %128 : vector<1x32xf32> to vector<8x32xf32>
    %130 = arith.addf %127, %129 : vector<8x32xf32>
    %cst_53 = arith.constant 0.000000e+00 : f32
    %131 = vector.broadcast %cst_53 : f32 to vector<8x32xf32>
    %132 = arith.maximumf %130, %131 : vector<8x32xf32>
    %133 = arith.addf %125, %132 : vector<8x32xf32>
    %c0_54 = arith.constant 0 : index
    %c0_55 = arith.constant 0 : index
    %134 = vector.load %arg15[%c0_54, %c0_55] : memref<1x32xf32, #tpu.memory_space<vmem>>, vector<1x32xf32>
    %c0_56 = arith.constant 0 : index
    %c0_57 = arith.constant 0 : index
    %135 = vector.load %arg16[%c0_56, %c0_57] : memref<1x32xf32, #tpu.memory_space<vmem>>, vector<1x32xf32>
    %cst_58 = arith.constant dense<0.000000e+00> : vector<8xf32>
    %136 = vector.multi_reduction <add>, %133, %cst_58 [1] : vector<8x32xf32> to vector<8xf32>
    %137 = vector.shape_cast %136 : vector<8xf32> to vector<8x1xf32>
    %cst_59 = arith.constant 3.200000e+01 : f32
    %138 = vector.broadcast %cst_59 : f32 to vector<8x1xf32>
    %139 = arith.divf %137, %138 : vector<8x1xf32>
    %140 = vector.broadcast %139 : vector<8x1xf32> to vector<8x32xf32>
    %141 = arith.subf %133, %140 : vector<8x32xf32>
    %142 = arith.mulf %141, %141 : vector<8x32xf32>
    %cst_60 = arith.constant dense<0.000000e+00> : vector<8xf32>
    %143 = vector.multi_reduction <add>, %142, %cst_60 [1] : vector<8x32xf32> to vector<8xf32>
    %144 = vector.shape_cast %143 : vector<8xf32> to vector<8x1xf32>
    %cst_61 = arith.constant 3.200000e+01 : f32
    %145 = vector.broadcast %cst_61 : f32 to vector<8x1xf32>
    %146 = arith.divf %144, %145 : vector<8x1xf32>
    %147 = vector.broadcast %139 : vector<8x1xf32> to vector<8x32xf32>
    %148 = arith.subf %133, %147 : vector<8x32xf32>
    %cst_62 = arith.constant 9.99999974E-6 : f32
    %149 = vector.broadcast %cst_62 : f32 to vector<8x1xf32>
    %150 = arith.addf %146, %149 : vector<8x1xf32>
    %151 = math.rsqrt %150 : vector<8x1xf32>
    %152 = vector.broadcast %151 : vector<8x1xf32> to vector<8x32xf32>
    %153 = arith.mulf %148, %152 : vector<8x32xf32>
    %154 = vector.broadcast %134 : vector<1x32xf32> to vector<8x32xf32>
    %155 = arith.mulf %153, %154 : vector<8x32xf32>
    %156 = vector.broadcast %135 : vector<1x32xf32> to vector<8x32xf32>
    %157 = arith.addf %155, %156 : vector<8x32xf32>
    %c0_63 = arith.constant 0 : index
    %c0_64 = arith.constant 0 : index
    %158 = vector.load %arg17[%c0_63, %c0_64] : memref<8x32xf32, #tpu.memory_space<vmem>>, vector<8x32xf32>
    tpu.vector_store %arg17[%c0_63, %c0_64], %157 {strides = array<i32>} : memref<8x32xf32, #tpu.memory_space<vmem>>, vector<8x32xf32>,
    return
  }
  func.func @transform_0(%arg0: i32) -> (i32, i32) {
    %c0_i32 = arith.constant 0 : i32
    %c0_i32_0 = arith.constant 0 : i32
    return %arg0, %c0_i32 : i32, i32
  }
  func.func @transform_1(%arg0: i32) -> (i32, i32) {
    %c0_i32 = arith.constant 0 : i32
    %c0_i32_0 = arith.constant 0 : i32
    return %arg0, %c0_i32 : i32, i32
  }
  func.func @transform_2(%arg0: i32) -> (i32, i32) {
    %c0_i32 = arith.constant 0 : i32
    %c0_i32_0 = arith.constant 0 : i32
    %c0_i32_1 = arith.constant 0 : i32
    return %c0_i32, %c0_i32_0 : i32, i32
  }
  func.func @transform_3(%arg0: i32) -> (i32, i32) {
    %c0_i32 = arith.constant 0 : i32
    %c0_i32_0 = arith.constant 0 : i32
    %c0_i32_1 = arith.constant 0 : i32
    return %c0_i32, %c0_i32_0 : i32, i32
  }
  func.func @transform_4(%arg0: i32) -> (i32, i32) {
    %c0_i32 = arith.constant 0 : i32
    %c0_i32_0 = arith.constant 0 : i32
    %c0_i32_1 = arith.constant 0 : i32
    return %c0_i32, %c0_i32_0 : i32, i32
  }
  func.func @transform_5(%arg0: i32) -> (i32, i32) {
    %c0_i32 = arith.constant 0 : i32
    %c0_i32_0 = arith.constant 0 : i32
    %c0_i32_1 = arith.constant 0 : i32
    return %c0_i32, %c0_i32_0 : i32, i32
  }
  func.func @transform_6(%arg0: i32) -> (i32, i32) {
    %c0_i32 = arith.constant 0 : i32
    %c0_i32_0 = arith.constant 0 : i32
    %c0_i32_1 = arith.constant 0 : i32
    return %c0_i32, %c0_i32_0 : i32, i32
  }
  func.func @transform_7(%arg0: i32) -> (i32, i32) {
    %c0_i32 = arith.constant 0 : i32
    %c0_i32_0 = arith.constant 0 : i32
    %c0_i32_1 = arith.constant 0 : i32
    return %c0_i32, %c0_i32_0 : i32, i32
  }
  func.func @transform_8(%arg0: i32) -> (i32, i32) {
    %c0_i32 = arith.constant 0 : i32
    %c0_i32_0 = arith.constant 0 : i32
    %c0_i32_1 = arith.constant 0 : i32
    return %c0_i32, %c0_i32_0 : i32, i32
  }
  func.func @transform_9(%arg0: i32) -> (i32, i32) {
    %c0_i32 = arith.constant 0 : i32
    %c0_i32_0 = arith.constant 0 : i32
    %c0_i32_1 = arith.constant 0 : i32
    return %c0_i32, %c0_i32_0 : i32, i32
  }
  func.func @transform_10(%arg0: i32) -> (i32, i32) {
    %c0_i32 = arith.constant 0 : i32
    %c0_i32_0 = arith.constant 0 : i32
    %c0_i32_1 = arith.constant 0 : i32
    return %c0_i32, %c0_i32_0 : i32, i32
  }
  func.func @transform_11(%arg0: i32) -> (i32, i32) {
    %c0_i32 = arith.constant 0 : i32
    %c0_i32_0 = arith.constant 0 : i32
    %c0_i32_1 = arith.constant 0 : i32
    return %c0_i32, %c0_i32_0 : i32, i32
  }
  func.func @transform_12(%arg0: i32) -> (i32, i32) {
    %c0_i32 = arith.constant 0 : i32
    %c0_i32_0 = arith.constant 0 : i32
    %c0_i32_1 = arith.constant 0 : i32
    return %c0_i32, %c0_i32_0 : i32, i32
  }
  func.func @transform_13(%arg0: i32) -> (i32, i32) {
    %c0_i32 = arith.constant 0 : i32
    %c0_i32_0 = arith.constant 0 : i32
    %c0_i32_1 = arith.constant 0 : i32
    return %c0_i32, %c0_i32_0 : i32, i32
  }
  func.func @transform_14(%arg0: i32) -> (i32, i32) {
    %c0_i32 = arith.constant 0 : i32
    %c0_i32_0 = arith.constant 0 : i32
    %c0_i32_1 = arith.constant 0 : i32
    return %c0_i32, %c0_i32_0 : i32, i32
  }
  func.func @transform_15(%arg0: i32) -> (i32, i32) {
    %c0_i32 = arith.constant 0 : i32
    %c0_i32_0 = arith.constant 0 : i32
    %c0_i32_1 = arith.constant 0 : i32
    return %c0_i32, %c0_i32_0 : i32, i32
  }
  func.func @transform_16(%arg0: i32) -> (i32, i32) {
    %c0_i32 = arith.constant 0 : i32
    %c0_i32_0 = arith.constant 0 : i32
    return %arg0, %c0_i32 : i32, i32
  }
}

module attributes {stable_mosaic.version = 11 : i64} {
  func.func @mab_kernel(%arg0: i32, %arg1: memref<8x32xf32, #tpu.memory_space<vmem>>, %arg2: memref<8x32xf32, #tpu.memory_space<vmem>>, %arg3: memref<32x32xf32, #tpu.memory_space<vmem>>, %arg4: memref<1x32xf32, #tpu.memory_space<vmem>>, %arg5: memref<32x32xf32, #tpu.memory_space<vmem>>, %arg6: memref<1x32xf32, #tpu.memory_space<vmem>>, %arg7: memref<32x32xf32, #tpu.memory_space<vmem>>, %arg8: memref<1x32xf32, #tpu.memory_space<vmem>>, %arg9: memref<32x32xf32, #tpu.memory_space<vmem>>, %arg10: memref<1x32xf32, #tpu.memory_space<vmem>>, %arg11: memref<1x32xf32, #tpu.memory_space<vmem>>, %arg12: memref<1x32xf32, #tpu.memory_space<vmem>>, %arg13: memref<32x32xf32, #tpu.memory_space<vmem>>, %arg14: memref<1x32xf32, #tpu.memory_space<vmem>>, %arg15: memref<1x32xf32, #tpu.memory_space<vmem>>, %arg16: memref<1x32xf32, #tpu.memory_space<vmem>>, %arg17: memref<8x32xf32, #tpu.memory_space<vmem>>) attributes {dimension_semantics = [#tpu.dimension_semantics<parallel>], iteration_bounds = array<i64: 2>, scalar_prefetch = 0 : i64, scratch_operands = 0 : i64, tpu.core_type = #tpu.core_type<tc>, window_params = [{transform_indices = @transform_0, window_bounds = array<i64: 8, 32>}, {transform_indices = @transform_1, window_bounds = array<i64: 8, 32>}, {pipeline_mode = #tpu.pipeline_mode<synchronous>, transform_indices = @transform_2, window_bounds = array<i64: 32, 32>}, {pipeline_mode = #tpu.pipeline_mode<synchronous>, transform_indices = @transform_3, window_bounds = array<i64: 1, 32>}, {pipeline_mode = #tpu.pipeline_mode<synchronous>, transform_indices = @transform_4, window_bounds = array<i64: 32, 32>}, {pipeline_mode = #tpu.pipeline_mode<synchronous>, transform_indices = @transform_5, window_bounds = array<i64: 1, 32>}, {pipeline_mode = #tpu.pipeline_mode<synchronous>, transform_indices = @transform_6, window_bounds = array<i64: 32, 32>}, {pipeline_mode = #tpu.pipeline_mode<synchronous>, transform_indices = @transform_7, window_bounds = array<i64: 1, 32>}, {pipeline_mode = #tpu.pipeline_mode<synchronous>, transform_indices = @transform_8, window_bounds = array<i64: 32, 32>}, {pipeline_mode = #tpu.pipeline_mode<synchronous>, transform_indices = @transform_9, window_bounds = array<i64: 1, 32>}, {pipeline_mode = #tpu.pipeline_mode<synchronous>, transform_indices = @transform_10, window_bounds = array<i64: 1, 32>}, {pipeline_mode = #tpu.pipeline_mode<synchronous>, transform_indices = @transform_11, window_bounds = array<i64: 1, 32>}, {pipeline_mode = #tpu.pipeline_mode<synchronous>, transform_indices = @transform_12, window_bounds = array<i64: 32, 32>}, {pipeline_mode = #tpu.pipeline_mode<synchronous>, transform_indices = @transform_13, window_bounds = array<i64: 1, 32>}, {pipeline_mode = #tpu.pipeline_mode<synchronous>, transform_indices = @transform_14, window_bounds = array<i64: 1, 32>}, {pipeline_mode = #tpu.pipeline_mode<synchronous>, transform_indices = @transform_15, window_bounds = array<i64: 1, 32>}, {transform_indices = @transform_16, window_bounds = array<i64: 8, 32>}]} {
    %c0 = arith.constant 0 : index
    %c0_0 = arith.constant 0 : index
    %0 = vector.load %arg1[%c0, %c0_0] : memref<8x32xf32, #tpu.memory_space<vmem>>, vector<8x32xf32>
    %c0_1 = arith.constant 0 : index
    %c0_2 = arith.constant 0 : index
    %1 = vector.load %arg2[%c0_1, %c0_2] : memref<8x32xf32, #tpu.memory_space<vmem>>, vector<8x32xf32>
    %c0_3 = arith.constant 0 : index
    %c0_4 = arith.constant 0 : index
    %2 = vector.load %arg3[%c0_3, %c0_4] : memref<32x32xf32, #tpu.memory_space<vmem>>, vector<32x32xf32>
    %cst = arith.constant dense<0.000000e+00> : vector<8x32xf32>
    %3 = tpu.matmul %0, %2, %cst {dimension_numbers = #tpu.dot_dimension_numbers<[1], [0], [0], [1], [0, 0, 1, 1], [], []>} : vector<8x32xf32>, vector<32x32xf32>, vector<8x32xf32> -> vector<8x32xf32>
    %c0_5 = arith.constant 0 : index
    %c0_6 = arith.constant 0 : index
    %4 = vector.load %arg4[%c0_5, %c0_6] : memref<1x32xf32, #tpu.memory_space<vmem>>, vector<1x32xf32>
    %5 = vector.broadcast %4 : vector<1x32xf32> to vector<8x32xf32>
    %6 = arith.addf %3, %5 : vector<8x32xf32>
    %cst_7 = arith.constant 0.353553385 : f32
    %7 = vector.broadcast %cst_7 : f32 to vector<8x32xf32>
    %8 = arith.mulf %6, %7 : vector<8x32xf32>
    %c0_8 = arith.constant 0 : index
    %c0_9 = arith.constant 0 : index
    %9 = vector.load %arg5[%c0_8, %c0_9] : memref<32x32xf32, #tpu.memory_space<vmem>>, vector<32x32xf32>
    %cst_10 = arith.constant dense<0.000000e+00> : vector<8x32xf32>
    %10 = tpu.matmul %1, %9, %cst_10 {dimension_numbers = #tpu.dot_dimension_numbers<[1], [0], [0], [1], [0, 0, 1, 1], [], []>} : vector<8x32xf32>, vector<32x32xf32>, vector<8x32xf32> -> vector<8x32xf32>
    %c0_11 = arith.constant 0 : index
    %c0_12 = arith.constant 0 : index
    %11 = vector.load %arg6[%c0_11, %c0_12] : memref<1x32xf32, #tpu.memory_space<vmem>>, vector<1x32xf32>
    %12 = vector.broadcast %11 : vector<1x32xf32> to vector<8x32xf32>
    %13 = arith.addf %10, %12 : vector<8x32xf32>
    %c0_13 = arith.constant 0 : index
    %c0_14 = arith.constant 0 : index
    %14 = vector.load %arg7[%c0_13, %c0_14] : memref<32x32xf32, #tpu.memory_space<vmem>>, vector<32x32xf32>
    %cst_15 = arith.constant dense<0.000000e+00> : vector<8x32xf32>
    %15 = tpu.matmul %1, %14, %cst_15 {dimension_numbers = #tpu.dot_dimension_numbers<[1], [0], [0], [1], [0, 0, 1, 1], [], []>} : vector<8x32xf32>, vector<32x32xf32>, vector<8x32xf32> -> vector<8x32xf32>
    %c0_16 = arith.constant 0 : index
    %c0_17 = arith.constant 0 : index
    %16 = vector.load %arg8[%c0_16, %c0_17] : memref<1x32xf32, #tpu.memory_space<vmem>>, vector<1x32xf32>
    %17 = vector.broadcast %16 : vector<1x32xf32> to vector<8x32xf32>
    %18 = arith.addf %15, %17 : vector<8x32xf32>
    %19 = vector.extract_strided_slice %8 {offsets = [0, 0], sizes = [8, 8], strides = [1, 1]} : vector<8x32xf32> to vector<8x8xf32>
    %20 = vector.shape_cast %19 : vector<8x8xf32> to vector<1x8x8xf32>
    %21 = vector.extract_strided_slice %13 {offsets = [0, 0], sizes = [8, 8], strides = [1, 1]} : vector<8x32xf32> to vector<8x8xf32>
    %22 = vector.shape_cast %21 : vector<8x8xf32> to vector<1x8x8xf32>
    %23 = vector.extract_strided_slice %18 {offsets = [0, 0], sizes = [8, 8], strides = [1, 1]} : vector<8x32xf32> to vector<8x8xf32>
    %24 = vector.shape_cast %23 : vector<8x8xf32> to vector<1x8x8xf32>
    "tpu.trace_start"() <{level = 10 : i32, message = "bnp,bmp->bnm"}> : () -> ()
    %cst_18 = arith.constant dense<0.000000e+00> : vector<1x8x8xf32>
    %25 = tpu.matmul %20, %22, %cst_18 {dimension_numbers = #tpu.dot_dimension_numbers<[2], [2], [1], [1], [0, 0, 0, 1, 1, 1], [0], [0]>} : vector<1x8x8xf32>, vector<1x8x8xf32>, vector<1x8x8xf32> -> vector<1x8x8xf32>
    "tpu.trace_stop"() : () -> ()
    %cst_19 = arith.constant dense<0xFF800000> : vector<1x8xf32>
    %26 = vector.multi_reduction <maximumf>, %25, %cst_19 [2] : vector<1x8x8xf32> to vector<1x8xf32>
    %27 = vector.shape_cast %26 : vector<1x8xf32> to vector<1x8x1xf32>
    %28 = vector.broadcast %27 : vector<1x8x1xf32> to vector<1x8x8xf32>
    %29 = arith.subf %25, %28 : vector<1x8x8xf32>
    %30 = math.exp %29 : vector<1x8x8xf32>
    %cst_20 = arith.constant dense<0.000000e+00> : vector<1x8xf32>
    %31 = vector.multi_reduction <add>, %30, %cst_20 [2] : vector<1x8x8xf32> to vector<1x8xf32>
    %32 = vector.shape_cast %31 : vector<1x8xf32> to vector<1x8x1xf32>
    %33 = tpu.reciprocal %32 : vector<1x8x1xf32> -> vector<1x8x1xf32>
    %34 = vector.broadcast %33 : vector<1x8x1xf32> to vector<1x8x8xf32>
    %35 = arith.mulf %30, %34 : vector<1x8x8xf32>
    "tpu.trace_start"() <{level = 10 : i32, message = "bnm,bmp->bnp"}> : () -> ()
    %cst_21 = arith.constant dense<0.000000e+00> : vector<1x8x8xf32>
    %36 = tpu.matmul %35, %24, %cst_21 {dimension_numbers = #tpu.dot_dimension_numbers<[2], [1], [1], [2], [0, 0, 0, 1, 1, 2], [0], [0]>} : vector<1x8x8xf32>, vector<1x8x8xf32>, vector<1x8x8xf32> -> vector<1x8x8xf32>
    "tpu.trace_stop"() : () -> ()
    %37 = vector.shape_cast %36 : vector<1x8x8xf32> to vector<8x8xf32>
    %38 = vector.extract_strided_slice %8 {offsets = [0, 8], sizes = [8, 8], strides = [1, 1]} : vector<8x32xf32> to vector<8x8xf32>
    %39 = vector.shape_cast %38 : vector<8x8xf32> to vector<1x8x8xf32>
    %40 = vector.extract_strided_slice %13 {offsets = [0, 8], sizes = [8, 8], strides = [1, 1]} : vector<8x32xf32> to vector<8x8xf32>
    %41 = vector.shape_cast %40 : vector<8x8xf32> to vector<1x8x8xf32>
    %42 = vector.extract_strided_slice %18 {offsets = [0, 8], sizes = [8, 8], strides = [1, 1]} : vector<8x32xf32> to vector<8x8xf32>
    %43 = vector.shape_cast %42 : vector<8x8xf32> to vector<1x8x8xf32>
    "tpu.trace_start"() <{level = 10 : i32, message = "bnp,bmp->bnm"}> : () -> ()
    %cst_22 = arith.constant dense<0.000000e+00> : vector<1x8x8xf32>
    %44 = tpu.matmul %39, %41, %cst_22 {dimension_numbers = #tpu.dot_dimension_numbers<[2], [2], [1], [1], [0, 0, 0, 1, 1, 1], [0], [0]>} : vector<1x8x8xf32>, vector<1x8x8xf32>, vector<1x8x8xf32> -> vector<1x8x8xf32>
    "tpu.trace_stop"() : () -> ()
    %cst_23 = arith.constant dense<0xFF800000> : vector<1x8xf32>
    %45 = vector.multi_reduction <maximumf>, %44, %cst_23 [2] : vector<1x8x8xf32> to vector<1x8xf32>
    %46 = vector.shape_cast %45 : vector<1x8xf32> to vector<1x8x1xf32>
    %47 = vector.broadcast %46 : vector<1x8x1xf32> to vector<1x8x8xf32>
    %48 = arith.subf %44, %47 : vector<1x8x8xf32>
    %49 = math.exp %48 : vector<1x8x8xf32>
    %cst_24 = arith.constant dense<0.000000e+00> : vector<1x8xf32>
    %50 = vector.multi_reduction <add>, %49, %cst_24 [2] : vector<1x8x8xf32> to vector<1x8xf32>
    %51 = vector.shape_cast %50 : vector<1x8xf32> to vector<1x8x1xf32>
    %52 = tpu.reciprocal %51 : vector<1x8x1xf32> -> vector<1x8x1xf32>
    %53 = vector.broadcast %52 : vector<1x8x1xf32> to vector<1x8x8xf32>
    %54 = arith.mulf %49, %53 : vector<1x8x8xf32>
    "tpu.trace_start"() <{level = 10 : i32, message = "bnm,bmp->bnp"}> : () -> ()
    %cst_25 = arith.constant dense<0.000000e+00> : vector<1x8x8xf32>
    %55 = tpu.matmul %54, %43, %cst_25 {dimension_numbers = #tpu.dot_dimension_numbers<[2], [1], [1], [2], [0, 0, 0, 1, 1, 2], [0], [0]>} : vector<1x8x8xf32>, vector<1x8x8xf32>, vector<1x8x8xf32> -> vector<1x8x8xf32>
    "tpu.trace_stop"() : () -> ()
    %56 = vector.shape_cast %55 : vector<1x8x8xf32> to vector<8x8xf32>
    %57 = vector.extract_strided_slice %8 {offsets = [0, 16], sizes = [8, 8], strides = [1, 1]} : vector<8x32xf32> to vector<8x8xf32>
    %58 = vector.shape_cast %57 : vector<8x8xf32> to vector<1x8x8xf32>
    %59 = vector.extract_strided_slice %13 {offsets = [0, 16], sizes = [8, 8], strides = [1, 1]} : vector<8x32xf32> to vector<8x8xf32>
    %60 = vector.shape_cast %59 : vector<8x8xf32> to vector<1x8x8xf32>
    %61 = vector.extract_strided_slice %18 {offsets = [0, 16], sizes = [8, 8], strides = [1, 1]} : vector<8x32xf32> to vector<8x8xf32>
    %62 = vector.shape_cast %61 : vector<8x8xf32> to vector<1x8x8xf32>
    "tpu.trace_start"() <{level = 10 : i32, message = "bnp,bmp->bnm"}> : () -> ()
    %cst_26 = arith.constant dense<0.000000e+00> : vector<1x8x8xf32>
    %63 = tpu.matmul %58, %60, %cst_26 {dimension_numbers = #tpu.dot_dimension_numbers<[2], [2], [1], [1], [0, 0, 0, 1, 1, 1], [0], [0]>} : vector<1x8x8xf32>, vector<1x8x8xf32>, vector<1x8x8xf32> -> vector<1x8x8xf32>
    "tpu.trace_stop"() : () -> ()
    %cst_27 = arith.constant dense<0xFF800000> : vector<1x8xf32>
    %64 = vector.multi_reduction <maximumf>, %63, %cst_27 [2] : vector<1x8x8xf32> to vector<1x8xf32>
    %65 = vector.shape_cast %64 : vector<1x8xf32> to vector<1x8x1xf32>
    %66 = vector.broadcast %65 : vector<1x8x1xf32> to vector<1x8x8xf32>
    %67 = arith.subf %63, %66 : vector<1x8x8xf32>
    %68 = math.exp %67 : vector<1x8x8xf32>
    %cst_28 = arith.constant dense<0.000000e+00> : vector<1x8xf32>
    %69 = vector.multi_reduction <add>, %68, %cst_28 [2] : vector<1x8x8xf32> to vector<1x8xf32>
    %70 = vector.shape_cast %69 : vector<1x8xf32> to vector<1x8x1xf32>
    %71 = tpu.reciprocal %70 : vector<1x8x1xf32> -> vector<1x8x1xf32>
    %72 = vector.broadcast %71 : vector<1x8x1xf32> to vector<1x8x8xf32>
    %73 = arith.mulf %68, %72 : vector<1x8x8xf32>
    "tpu.trace_start"() <{level = 10 : i32, message = "bnm,bmp->bnp"}> : () -> ()
    %cst_29 = arith.constant dense<0.000000e+00> : vector<1x8x8xf32>
    %74 = tpu.matmul %73, %62, %cst_29 {dimension_numbers = #tpu.dot_dimension_numbers<[2], [1], [1], [2], [0, 0, 0, 1, 1, 2], [0], [0]>} : vector<1x8x8xf32>, vector<1x8x8xf32>, vector<1x8x8xf32> -> vector<1x8x8xf32>
    "tpu.trace_stop"() : () -> ()
    %75 = vector.shape_cast %74 : vector<1x8x8xf32> to vector<8x8xf32>
    %76 = vector.extract_strided_slice %8 {offsets = [0, 24], sizes = [8, 8], strides = [1, 1]} : vector<8x32xf32> to vector<8x8xf32>
    %77 = vector.shape_cast %76 : vector<8x8xf32> to vector<1x8x8xf32>
    %78 = vector.extract_strided_slice %13 {offsets = [0, 24], sizes = [8, 8], strides = [1, 1]} : vector<8x32xf32> to vector<8x8xf32>
    %79 = vector.shape_cast %78 : vector<8x8xf32> to vector<1x8x8xf32>
    %80 = vector.extract_strided_slice %18 {offsets = [0, 24], sizes = [8, 8], strides = [1, 1]} : vector<8x32xf32> to vector<8x8xf32>
    %81 = vector.shape_cast %80 : vector<8x8xf32> to vector<1x8x8xf32>
    "tpu.trace_start"() <{level = 10 : i32, message = "bnp,bmp->bnm"}> : () -> ()
    %cst_30 = arith.constant dense<0.000000e+00> : vector<1x8x8xf32>
    %82 = tpu.matmul %77, %79, %cst_30 {dimension_numbers = #tpu.dot_dimension_numbers<[2], [2], [1], [1], [0, 0, 0, 1, 1, 1], [0], [0]>} : vector<1x8x8xf32>, vector<1x8x8xf32>, vector<1x8x8xf32> -> vector<1x8x8xf32>
    "tpu.trace_stop"() : () -> ()
    %cst_31 = arith.constant dense<0xFF800000> : vector<1x8xf32>
    %83 = vector.multi_reduction <maximumf>, %82, %cst_31 [2] : vector<1x8x8xf32> to vector<1x8xf32>
    %84 = vector.shape_cast %83 : vector<1x8xf32> to vector<1x8x1xf32>
    %85 = vector.broadcast %84 : vector<1x8x1xf32> to vector<1x8x8xf32>
    %86 = arith.subf %82, %85 : vector<1x8x8xf32>
    %87 = math.exp %86 : vector<1x8x8xf32>
    %cst_32 = arith.constant dense<0.000000e+00> : vector<1x8xf32>
    %88 = vector.multi_reduction <add>, %87, %cst_32 [2] : vector<1x8x8xf32> to vector<1x8xf32>
    %89 = vector.shape_cast %88 : vector<1x8xf32> to vector<1x8x1xf32>
    %90 = tpu.reciprocal %89 : vector<1x8x1xf32> -> vector<1x8x1xf32>
    %91 = vector.broadcast %90 : vector<1x8x1xf32> to vector<1x8x8xf32>
    %92 = arith.mulf %87, %91 : vector<1x8x8xf32>
    "tpu.trace_start"() <{level = 10 : i32, message = "bnm,bmp->bnp"}> : () -> ()
    %cst_33 = arith.constant dense<0.000000e+00> : vector<1x8x8xf32>
    %93 = tpu.matmul %92, %81, %cst_33 {dimension_numbers = #tpu.dot_dimension_numbers<[2], [1], [1], [2], [0, 0, 0, 1, 1, 2], [0], [0]>} : vector<1x8x8xf32>, vector<1x8x8xf32>, vector<1x8x8xf32> -> vector<1x8x8xf32>
    "tpu.trace_stop"() : () -> ()
    %94 = vector.shape_cast %93 : vector<1x8x8xf32> to vector<8x8xf32>
    %95 = tpu.concatenate %37, %56, %75, %94 in 1 : vector<8x8xf32>, vector<8x8xf32>, vector<8x8xf32>, vector<8x8xf32> -> vector<8x32xf32>
    %c0_34 = arith.constant 0 : index
    %c0_35 = arith.constant 0 : index
    %96 = vector.load %arg9[%c0_34, %c0_35] : memref<32x32xf32, #tpu.memory_space<vmem>>, vector<32x32xf32>
    %cst_36 = arith.constant dense<0.000000e+00> : vector<8x32xf32>
    %97 = tpu.matmul %95, %96, %cst_36 {dimension_numbers = #tpu.dot_dimension_numbers<[1], [0], [0], [1], [0, 0, 1, 1], [], []>} : vector<8x32xf32>, vector<32x32xf32>, vector<8x32xf32> -> vector<8x32xf32>
    %c0_37 = arith.constant 0 : index
    %c0_38 = arith.constant 0 : index
    %98 = vector.load %arg10[%c0_37, %c0_38] : memref<1x32xf32, #tpu.memory_space<vmem>>, vector<1x32xf32>
    %99 = vector.broadcast %98 : vector<1x32xf32> to vector<8x32xf32>
    %100 = arith.addf %97, %99 : vector<8x32xf32>
    %101 = arith.addf %0, %100 : vector<8x32xf32>
    %c0_39 = arith.constant 0 : index
    %c0_40 = arith.constant 0 : index
    %102 = vector.load %arg11[%c0_39, %c0_40] : memref<1x32xf32, #tpu.memory_space<vmem>>, vector<1x32xf32>
    %c0_41 = arith.constant 0 : index
    %c0_42 = arith.constant 0 : index
    %103 = vector.load %arg12[%c0_41, %c0_42] : memref<1x32xf32, #tpu.memory_space<vmem>>, vector<1x32xf32>
    %cst_43 = arith.constant dense<0.000000e+00> : vector<8xf32>
    %104 = vector.multi_reduction <add>, %101, %cst_43 [1] : vector<8x32xf32> to vector<8xf32>
    %105 = vector.shape_cast %104 : vector<8xf32> to vector<8x1xf32>
    %cst_44 = arith.constant 3.200000e+01 : f32
    %106 = vector.broadcast %cst_44 : f32 to vector<8x1xf32>
    %107 = arith.divf %105, %106 : vector<8x1xf32>
    %108 = vector.broadcast %107 : vector<8x1xf32> to vector<8x32xf32>
    %109 = arith.subf %101, %108 : vector<8x32xf32>
    %110 = arith.mulf %109, %109 : vector<8x32xf32>
    %cst_45 = arith.constant dense<0.000000e+00> : vector<8xf32>
    %111 = vector.multi_reduction <add>, %110, %cst_45 [1] : vector<8x32xf32> to vector<8xf32>
    %112 = vector.shape_cast %111 : vector<8xf32> to vector<8x1xf32>
    %cst_46 = arith.constant 3.200000e+01 : f32
    %113 = vector.broadcast %cst_46 : f32 to vector<8x1xf32>
    %114 = arith.divf %112, %113 : vector<8x1xf32>
    %115 = vector.broadcast %107 : vector<8x1xf32> to vector<8x32xf32>
    %116 = arith.subf %101, %115 : vector<8x32xf32>
    %cst_47 = arith.constant 9.99999974E-6 : f32
    %117 = vector.broadcast %cst_47 : f32 to vector<8x1xf32>
    %118 = arith.addf %114, %117 : vector<8x1xf32>
    %119 = math.rsqrt %118 : vector<8x1xf32>
    %120 = vector.broadcast %119 : vector<8x1xf32> to vector<8x32xf32>
    %121 = arith.mulf %116, %120 : vector<8x32xf32>
    %122 = vector.broadcast %102 : vector<1x32xf32> to vector<8x32xf32>
    %123 = arith.mulf %121, %122 : vector<8x32xf32>
    %124 = vector.broadcast %103 : vector<1x32xf32> to vector<8x32xf32>
    %125 = arith.addf %123, %124 : vector<8x32xf32>
    %c0_48 = arith.constant 0 : index
    %c0_49 = arith.constant 0 : index
    %126 = vector.load %arg13[%c0_48, %c0_49] : memref<32x32xf32, #tpu.memory_space<vmem>>, vector<32x32xf32>
    %cst_50 = arith.constant dense<0.000000e+00> : vector<8x32xf32>
    %127 = tpu.matmul %125, %126, %cst_50 {dimension_numbers = #tpu.dot_dimension_numbers<[1], [0], [0], [1], [0, 0, 1, 1], [], []>} : vector<8x32xf32>, vector<32x32xf32>, vector<8x32xf32> -> vector<8x32xf32>
    %c0_51 = arith.constant 0 : index
    %c0_52 = arith.constant 0 : index
    %128 = vector.load %arg14[%c0_51, %c0_52] : memref<1x32xf32, #tpu.memory_space<vmem>>, vector<1x32xf32>
    %129 = vector.broadcast %128 : vector<1x32xf32> to vector<8x32xf32>
    %130 = arith.addf %127, %129 : vector<8x32xf32>
    %cst_53 = arith.constant 0.000000e+00 : f32
    %131 = vector.broadcast %cst_53 : f32 to vector<8x32xf32>
    %132 = arith.maximumf %130, %131 : vector<8x32xf32>
    %133 = arith.addf %125, %132 : vector<8x32xf32>
    %c0_54 = arith.constant 0 : index
    %c0_55 = arith.constant 0 : index
    %134 = vector.load %arg15[%c0_54, %c0_55] : memref<1x32xf32, #tpu.memory_space<vmem>>, vector<1x32xf32>
    %c0_56 = arith.constant 0 : index
    %c0_57 = arith.constant 0 : index
    %135 = vector.load %arg16[%c0_56, %c0_57] : memref<1x32xf32, #tpu.memory_space<vmem>>, vector<1x32xf32>
    %cst_58 = arith.constant dense<0.000000e+00> : vector<8xf32>
    %136 = vector.multi_reduction <add>, %133, %cst_58 [1] : vector<8x32xf32> to vector<8xf32>
    %137 = vector.shape_cast %136 : vector<8xf32> to vector<8x1xf32>
    %cst_59 = arith.constant 3.200000e+01 : f32
    %138 = vector.broadcast %cst_59 : f32 to vector<8x1xf32>
    %139 = arith.divf %137, %138 : vector<8x1xf32>
    %140 = vector.broadcast %139 : vector<8x1xf32> to vector<8x32xf32>
    %141 = arith.subf %133, %140 : vector<8x32xf32>
    %142 = arith.mulf %141, %141 : vector<8x32xf32>
    %cst_60 = arith.constant dense<0.000000e+00> : vector<8xf32>
    %143 = vector.multi_reduction <add>, %142, %cst_60 [1] : vector<8x32xf32> to vector<8xf32>
    %144 = vector.shape_cast %143 : vector<8xf32> to vector<8x1xf32>
    %cst_61 = arith.constant 3.200000e+01 : f32
    %145 = vector.broadcast %cst_61 : f32 to vector<8x1xf32>
    %146 = arith.divf %144, %145 : vector<8x1xf32>
    %147 = vector.broadcast %139 : vector<8x1xf32> to vector<8x32xf32>
    %148 = arith.subf %133, %147 : vector<8x32xf32>
    %cst_62 = arith.constant 9.99999974E-6 : f32
    %149 = vector.broadcast %cst_62 : f32 to vector<8x1xf32>
    %150 = arith.addf %146, %149 : vector<8x1xf32>
    %151 = math.rsqrt %150 : vector<8x1xf32>
    %152 = vector.broadcast %151 : vector<8x1xf32> to vector<8x32xf32>
    %153 = arith.mulf %148, %152 : vector<8x32xf32>
    %154 = vector.broadcast %134 : vector<1x32xf32> to vector<8x32xf32>
    %155 = arith.mulf %153, %154 : vector<8x32xf32>
    %156 = vector.broadcast %135 : vector<1x32xf32> to vector<8x32xf32>
    %157 = arith.addf %155, %156 : vector<8x32xf32>
    %c0_63 = arith.constant 0 : index
    %c0_64 = arith.constant 0 : index
    %158 = vector.load %arg17[%c0_63, %c0_64] : memref<8x32xf32, #tpu.memory_space<vmem>>, vector<8x32xf32>
    tpu.vector_store %arg17[%c0_63, %c0_64], %157 {strides = array<i32>} : memref<8x32xf32, #tpu.memory_space<vmem>>, vector<8x32xf32>,
    return
  }
  func.func @transform_0(%arg0: i32) -> (i32, i32) {
    %c0_i32 = arith.constant 0 : i32
    %c0_i32_0 = arith.constant 0 : i32
    return %arg0, %c0_i32 : i32, i32
  }
  func.func @transform_1(%arg0: i32) -> (i32, i32) {
    %c0_i32 = arith.constant 0 : i32
    %c0_i32_0 = arith.constant 0 : i32
    return %arg0, %c0_i32 : i32, i32
  }
  func.func @transform_2(%arg0: i32) -> (i32, i32) {
    %c0_i32 = arith.constant 0 : i32
    %c0_i32_0 = arith.constant 0 : i32
    %c0_i32_1 = arith.constant 0 : i32
    return %c0_i32, %c0_i32_0 : i32, i32
  }
  func.func @transform_3(%arg0: i32) -> (i32, i32) {
    %c0_i32 = arith.constant 0 : i32
    %c0_i32_0 = arith.constant 0 : i32
    %c0_i32_1 = arith.constant 0 : i32
    return %c0_i32, %c0_i32_0 : i32, i32
  }
  func.func @transform_4(%arg0: i32) -> (i32, i32) {
    %c0_i32 = arith.constant 0 : i32
    %c0_i32_0 = arith.constant 0 : i32
    %c0_i32_1 = arith.constant 0 : i32
    return %c0_i32, %c0_i32_0 : i32, i32
  }
  func.func @transform_5(%arg0: i32) -> (i32, i32) {
    %c0_i32 = arith.constant 0 : i32
    %c0_i32_0 = arith.constant 0 : i32
    %c0_i32_1 = arith.constant 0 : i32
    return %c0_i32, %c0_i32_0 : i32, i32
  }
  func.func @transform_6(%arg0: i32) -> (i32, i32) {
    %c0_i32 = arith.constant 0 : i32
    %c0_i32_0 = arith.constant 0 : i32
    %c0_i32_1 = arith.constant 0 : i32
    return %c0_i32, %c0_i32_0 : i32, i32
  }
  func.func @transform_7(%arg0: i32) -> (i32, i32) {
    %c0_i32 = arith.constant 0 : i32
    %c0_i32_0 = arith.constant 0 : i32
    %c0_i32_1 = arith.constant 0 : i32
    return %c0_i32, %c0_i32_0 : i32, i32
  }
  func.func @transform_8(%arg0: i32) -> (i32, i32) {
    %c0_i32 = arith.constant 0 : i32
    %c0_i32_0 = arith.constant 0 : i32
    %c0_i32_1 = arith.constant 0 : i32
    return %c0_i32, %c0_i32_0 : i32, i32
  }
  func.func @transform_9(%arg0: i32) -> (i32, i32) {
    %c0_i32 = arith.constant 0 : i32
    %c0_i32_0 = arith.constant 0 : i32
    %c0_i32_1 = arith.constant 0 : i32
    return %c0_i32, %c0_i32_0 : i32, i32
  }
  func.func @transform_10(%arg0: i32) -> (i32, i32) {
    %c0_i32 = arith.constant 0 : i32
    %c0_i32_0 = arith.constant 0 : i32
    %c0_i32_1 = arith.constant 0 : i32
    return %c0_i32, %c0_i32_0 : i32, i32
  }
  func.func @transform_11(%arg0: i32) -> (i32, i32) {
    %c0_i32 = arith.constant 0 : i32
    %c0_i32_0 = arith.constant 0 : i32
    %c0_i32_1 = arith.constant 0 : i32
    return %c0_i32, %c0_i32_0 : i32, i32
  }
  func.func @transform_12(%arg0: i32) -> (i32, i32) {
    %c0_i32 = arith.constant 0 : i32
    %c0_i32_0 = arith.constant 0 : i32
    %c0_i32_1 = arith.constant 0 : i32
    return %c0_i32, %c0_i32_0 : i32, i32
  }
  func.func @transform_13(%arg0: i32) -> (i32, i32) {
    %c0_i32 = arith.constant 0 : i32
    %c0_i32_0 = arith.constant 0 : i32
    %c0_i32_1 = arith.constant 0 : i32
    return %c0_i32, %c0_i32_0 : i32, i32
  }
  func.func @transform_14(%arg0: i32) -> (i32, i32) {
    %c0_i32 = arith.constant 0 : i32
    %c0_i32_0 = arith.constant 0 : i32
    %c0_i32_1 = arith.constant 0 : i32
    return %c0_i32, %c0_i32_0 : i32, i32
  }
  func.func @transform_15(%arg0: i32) -> (i32, i32) {
    %c0_i32 = arith.constant 0 : i32
    %c0_i32_0 = arith.constant 0 : i32
    %c0_i32_1 = arith.constant 0 : i32
    return %c0_i32, %c0_i32_0 : i32, i32
  }
  func.func @transform_16(%arg0: i32) -> (i32, i32) {
    %c0_i32 = arith.constant 0 : i32
    %c0_i32_0 = arith.constant 0 : i32
    return %arg0, %c0_i32 : i32, i32
  }
}

</mosaic_0001>

<bundles_post_ra>
// kernel: tpu_custom_call.1
= control target key start
LH: loop header
LB: loop body
LE: loop exit
PB: predicated region body
PF: predicated region fallthrough
CT: control target
= control target key end

     0   :  { %s3106_s0 = inlined_call_operand.hbm [shape: f32[16,32], index: 0, kind: input, shape index: {}]   ;;  %s3107_s1 = inlined_call_operand.hbm [shape: f32[16,32], index: 1, kind: input, shape index: {}]   ;;  %s3108_s2 = inlined_call_operand.hbm [shape: f32[32,32], index: 2, kind: input, shape index: {}]   ;;  %s3109_s3 = inlined_call_operand.vmem [shape: f32[1,32], index: 3, kind: input, shape index: {}]   ;;  %s3110_s4 = inlined_call_operand.hbm [shape: f32[32,32], index: 4, kind: input, shape index: {}]   ;;  %s3111_s5 = inlined_call_operand.vmem [shape: f32[1,32], index: 5, kind: input, shape index: {}]   ;;  %s3112_s6 = inlined_call_operand.hbm [shape: f32[32,32], index: 6, kind: input, shape index: {}]   ;;  %s3113_s7 = inlined_call_operand.vmem [shape: f32[1,32], index: 7, kind: input, shape index: {}]   ;;  %s3114_s8 = inlined_call_operand.hbm [shape: f32[32,32], index: 8, kind: input, shape index: {}]   ;;  %s3115_s9 = inlined_call_operand.vmem [shape: f32[1,32], index: 9, kind: input, shape index: {}]   ;;  %s3116_s10 = inlined_call_operand.vmem [shape: f32[1,32], index: 10, kind: input, shape index: {}]   ;;  %s3117_s11 = inlined_call_operand.vmem [shape: f32[1,32], index: 11, kind: input, shape index: {}]   ;;  %s3118_s12 = inlined_call_operand.vmem [shape: f32[32,32], index: 12, kind: input, shape index: {}]   ;;  %s3119_s13 = inlined_call_operand.vmem [shape: f32[1,32], index: 13, kind: input, shape index: {}]   ;;  %s3120_s14 = inlined_call_operand.vmem [shape: f32[1,32], index: 14, kind: input, shape index: {}]   ;;  %s3121_s15 = inlined_call_operand.vmem [shape: f32[1,32], index: 15, kind: input, shape index: {}]   ;;  %s3122_s16 = inlined_call_operand.hbm [shape: f32[16,32], index: 16, kind: output, shape index: {}]  }
   0x1   :  { %3131 = sst [smem:[#allocation22_spill]] %s3106_s0 }
   0x2   :  { %3132 = sst [smem:[#allocation23_spill]] %s3108_s2 }
   0x3   :  { %3133 = sst [smem:[#allocation24_spill]] %s3110_s4 }
   0x4   :  { %3134 = sst [smem:[#allocation25_spill]] %s3112_s6 }
   0x5   :  { %3135 = sst [smem:[#allocation26_spill]] %s3114_s8 }
   0x6   :  { %3136 = sst [smem:[#allocation27_spill]] %s3116_s10 }
   0x7   :  { %3137 = sst [smem:[#allocation28_spill]] %s3117_s11 }
   0x8   :  { %3138 = sst [smem:[#allocation29_spill]] %s3118_s12 }
   0x9   :  { %3139 = sst [smem:[#allocation30_spill]] %s3119_s13 }
   0xa   :  { %3140 = sst [smem:[#allocation31_spill]] %s3120_s14 }
   0xb   :  { %3141 = sst [smem:[#allocation32_spill]] %s3121_s15 }
   0xc   :  { %3142 = sst [smem:[#allocation33_spill]] %s3122_s16 }
   0xd   :  { %21 = vsyncpa [#allocation3], 0 }
   0xe   :  { %23 = vsyncpa [#allocation3 + $0x1], 0 }
   0xf   :  { %24 = vsyncpa [#allocation6], 0 }
  0x10   :  { %26 = vsyncpa [#allocation6 + $0x1], 0 }
  0x11   :  { %27 = vsyncpa [#allocation9], 0 }
  0x12   :  { %28 = vsyncpa [#allocation12], 0 }
  0x13   :  { %29 = vsyncpa [#allocation4], 0 }
  0x14   :  { %31 = vsyncpa [#allocation4 + $0x1], 0  ;;  %s2632_s21 = smov 0   ;;  %s2634_s22 = smov 0  }
  0x15   :  { %s2636_s23 = smov 0   ;;  %s2638_s24 = smov 0  }
  0x16 LB: > { %3143 = sst [smem:[#allocation20_spill]] %s2523_s23  ;;  %s2529_s25 = smov [#allocation7]   ;;  %s2527_s24 = sphi %s2638_s24, %s3181_s24   ;;  %s2523_s23 = sphi %s2636_s23, %s3178_s23   ;;  %s2519_s22 = sphi %s2634_s22, %s3180_s22   ;;  %s2515_s21 = sphi %s2632_s21, %s3179_s21  }
  0x17   : > { %s426_s26 = sshll.u32 %s2529_s25, 4  ;;  %s2653_s27 = sadd.s32 4294967295, %s2527_s24   ;;  %s2658_s26 = int_to_ptr.vmem [resolvable:$true] %s426_s26 }
  0x18   : > { %p1936_p0 = scmp.ge.s32.totalorder %s2527_s24, 1  ;;  %p3126_p1 = scmp.eq.s32.totalorder %s2653_s27, 0 }
  0x19   : > { %p414_p2 = scmp.lt.s32.totalorder %s2527_s24, 3  ;;  %s2530_s29 = smov [#allocation8]  }
  0x1a   : > { %s442_s30 = sshll.u32 %s2530_s29, 4  ;;  %s2531_s17 = smov [#allocation10]   ;;  %s2673_s30 = int_to_ptr.vmem [resolvable:$true] %s442_s30 }
  0x1b   : > { %p2660_p3 = pnand %p1936_p0, %p414_p2  ;;  %s458_s18 = sshll.u32 %s2531_s17, 4  ;;  %s2675_s18 = int_to_ptr.vmem [resolvable:$true] %s458_s18 }
  0x1c   : > { %s3146_s2 = sld [smem:[#allocation23_spill]] }
  0x1d   : > { %s3144_s28 = scalar_select %p2660_p3, 1, 0 }
  0x1e   : > { %p2172_p5 = pneg %p2660_p3 }
  0x20   : > { %p2669_p6 = pnand %p2172_p5, %p3126_p1 }
  0x22   : > { %s2273_s25 = scalar_lea.hbm %s3146_s2, 512  ;;  %p2685_p8 = pneg %p2669_p6 }
  0x23   : > { %p2274_p7 = scmp.ne.s32.totalorder %s3146_s2, %s2273_s25  ;;  %p2280_p11 = scmp.lt.u32.totalorder %s2273_s25, %s3146_s2 }
  0x25   : > { %p2276_p9 = pnand %p2685_p8, %p2274_p7 }
  0x27   : > { %p2277_p10 = pneg %p2276_p9 }
  0x29   : > { %p2282_p12 = pnand %p2280_p11, %p2277_p10 }
  0x2b   : > { %2285 = shalt.err (!%p2282_p12)
}
  0x2c   : > { %s2286_s15 = scalar_lea.vmem %s2658_s26, 512  ;;  %p2294_p5 = scmp.lt.s32.totalorder %s2658_s26, %s2658_s26 }
  0x2d   : > { %p2287_p13 = scmp.ne.s32.totalorder %s2658_s26, %s2286_s15  ;;  %p2295_p4 = scmp.lt.s32.totalorder %s2286_s15, %s2286_s15 }
  0x2f   : > { %p2289_p0 = pnand %p2287_p13, %p2685_p8  ;;  %p2296_p7 = por %p2295_p4, %p2294_p5 }
  0x31   : > { %p2290_p2 = pneg %p2289_p0 }
  0x33   : > { %p2297_p9 = pnand %p2296_p7, %p2290_p2 }
  0x35   : > { %2300 = shalt.err (!%p2297_p9)
}
  0x36   : > { %s2532_s16 = smov 128   ;;  %s2533_s14 = smov 8  }
  0x37   : > { %2175 = dma.hbm_to_vmem [thread:$0]  (!%p2669_p6), %s3146_s2, 512, %s2658_s26, [#allocation6], %s2532_s16, %s2532_s16, %s2533_s14  }
  0x38   : > { %s3148_s4 = sld [smem:[#allocation24_spill]] }
  0x3e   : > { %s2301_s15 = scalar_lea.hbm %s3148_s4, 512 }
  0x3f   : > { %p2302_p4 = scmp.ne.s32.totalorder %s3148_s4, %s2301_s15  ;;  %p2308_p12 = scmp.lt.u32.totalorder %s2301_s15, %s3148_s4 }
  0x41   : > { %p2304_p10 = pnand %p2302_p4, %p2685_p8 }
  0x43   : > { %p2305_p11 = pneg %p2304_p10 }
  0x45   : > { %p2310_p13 = pnand %p2308_p12, %p2305_p11 }
  0x47   : > { %2313 = shalt.err (!%p2310_p13)
}
  0x48   : > { %s2314_s26 = scalar_lea.vmem %s2673_s30, 512  ;;  %p2322_p7 = scmp.lt.s32.totalorder %s2673_s30, %s2673_s30 }
  0x49   : > { %p2315_p0 = scmp.ne.s32.totalorder %s2673_s30, %s2314_s26  ;;  %p2323_p9 = scmp.lt.s32.totalorder %s2314_s26, %s2314_s26 }
  0x4b   : > { %p2317_p2 = pnand %p2315_p0, %p2685_p8  ;;  %p2324_p4 = por %p2323_p9, %p2322_p7 }
  0x4d   : > { %p2318_p5 = pneg %p2317_p2 }
  0x4f   : > { %p2325_p10 = pnand %p2324_p4, %p2318_p5 }
  0x51   : > { %2328 = shalt.err (!%p2325_p10)
}
  0x52   : > { %2178 = dma.hbm_to_vmem [thread:$0]  (!%p2669_p6), %s3148_s4, 512, %s2673_s30, [#allocation9], %s2532_s16, %s2532_s16, %s2533_s14  }
  0x53   : > { %s3149_s6 = sld [smem:[#allocation25_spill]] }
  0x59   : > { %s2329_s19 = scalar_lea.hbm %s3149_s6, 512 }
  0x5a   : > { %p2330_p11 = scmp.ne.s32.totalorder %s3149_s6, %s2329_s19  ;;  %p2336_p0 = scmp.lt.u32.totalorder %s2329_s19, %s3149_s6 }
  0x5c   : > { %p2332_p12 = pnand %p2330_p11, %p2685_p8 }
  0x5e   : > { %p2333_p13 = pneg %p2332_p12 }
  0x60   : > { %p2338_p2 = pnand %p2336_p0, %p2333_p13 }
  0x62   : > { %2341 = shalt.err (!%p2338_p2)
}
  0x63   : > { %s2342_s30 = scalar_lea.vmem %s2675_s18, 512  ;;  %p2350_p4 = scmp.lt.s32.totalorder %s2675_s18, %s2675_s18 }
  0x64   : > { %p2343_p5 = scmp.ne.s32.totalorder %s2675_s18, %s2342_s30  ;;  %p2351_p10 = scmp.lt.s32.totalorder %s2342_s30, %s2342_s30 }
  0x66   : > { %p2345_p7 = pnand %p2343_p5, %p2685_p8  ;;  %p2352_p11 = por %p2351_p10, %p2350_p4 }
  0x68   : > { %p2346_p9 = pneg %p2345_p7 }
  0x6a   : > { %p2353_p12 = pnand %p2352_p11, %p2346_p9 }
  0x6c   : > { %2356 = shalt.err (!%p2353_p12)
}
  0x6d   : > { %2181 = dma.hbm_to_vmem [thread:$0]  (!%p2669_p6), %s3149_s6, 512, %s2675_s18, [#allocation9], %s2532_s16, %s2532_s16, %s2533_s14  }
  0x6e   : > { %s2534_s11 = smov [#allocation11]   ;;  %s3150_s8 = sld [smem:[#allocation26_spill]] }
  0x6f   : > { %s474_s12 = sshll.u32 %s2534_s11, 4  ;;  %s475_s12 = int_to_ptr.vmem [resolvable:$true] %s474_s12 }
  0x74   : > { %s2357_s20 = scalar_lea.hbm %s3150_s8, 512 }
  0x75   : > { %p2358_p13 = scmp.ne.s32.totalorder %s3150_s8, %s2357_s20  ;;  %p2364_p5 = scmp.lt.u32.totalorder %s2357_s20, %s3150_s8 }
  0x77   : > { %p2360_p0 = pnand %p2358_p13, %p2685_p8 }
  0x79   : > { %p2361_p2 = pneg %p2360_p0 }
  0x7b   : > { %p2366_p7 = pnand %p2364_p5, %p2361_p2 }
  0x7d   : > { %2369 = shalt.err (!%p2366_p7)
}
  0x7e   : > { %s2370_s18 = scalar_lea.vmem %s475_s12, 512  ;;  %p2378_p11 = scmp.lt.s32.totalorder %s475_s12, %s475_s12 }
  0x7f   : > { %p2371_p9 = scmp.ne.s32.totalorder %s475_s12, %s2370_s18  ;;  %p2379_p12 = scmp.lt.s32.totalorder %s2370_s18, %s2370_s18 }
  0x81   : > { %p2373_p4 = pnand %p2371_p9, %p2685_p8  ;;  %p2380_p1 = por %p2379_p12, %p2378_p11 }
  0x83   : > { %p2374_p10 = pneg %p2373_p4 }
  0x85   : > { %p2381_p3 = pnand %p2380_p1, %p2374_p10 }
  0x87   : > { %2384 = shalt.err (!%p2381_p3)
}
  0x88   : > { %2184 = dma.hbm_to_vmem [thread:$0]  (!%p2669_p6), %s3150_s8, 512, %s475_s12, [#allocation12], %s2532_s16, %s2532_s16, %s2533_s14  }
  0x89   : > { %s1935_s0 = sadd.s32 4294967294, %s2527_s24   ;;  %s2784_s29 = sadd.s32 1, %s2527_s24  }
  0x8a   : > { %s41_s11 = ssub.s32 %s2527_s24, %s2784_s29  ;;  %s44_s13 = sadd.s32 1, %s2523_s23 }
  0x8b   : > { %p42_p1 = scmp.eq.s32.totalorder %s41_s11, 0  ;;  %p51_p3 = scmp.ne.s32.totalorder %s2523_s23, %s2519_s22 }
  0x8c   : > { %p52_p8 = scmp.eq.s32.totalorder %s2527_s24, 0  ;;  %p57_p13 = scmp.ne.s32.totalorder %s2519_s22, %s2515_s21 }
  0x8d   : > { %s2795_s19 = scalar_select %p42_p1, %s2523_s23, %s44_s13  }
  0x8e   : > { %p2797_p0 = por %p52_p8, %p51_p3  ;;  %p3153_p2 = scmp.eq.s32.totalorder %s2653_s27, 0 }
  0x8f   : > { %3151 = sst [smem:[#allocation21_spill]] %s2795_s19  ;;  %p401_p5 = scmp.eq.s32.totalorder %s2653_s27, 1 }
  0x90   : > { %p2803_p6 = por %p3153_p2, %p57_p13  ;;  %p407_p7 = scmp.eq.s32.totalorder %s1935_s0, 1 }
  0x91   : > { %p2200_p9 = scmp.lt.s32.totalorder %s2527_s24, 2  ;;  %s509_s14 = sand.u32 1, %s2523_s23  }
  0x92   : > { %s3154_s16 = scalar_select %p2803_p6, 1, 0 }
  0x93   : > { %p2810_p4 = por %p401_p5, %p51_p3  ;;  %p2814_p10 = por %p407_p7, %p57_p13 }
  0x94   : > { %s2818_s17 = sshll.u32 %s509_s14, 3  ;;  %s1943_s15 = sshll.u32 %s2527_s24, 7 }
  0x95   : > { %s3155_s12 = scalar_select %p2810_p4, 1, 0 }
  0x96   : > { %s3156_s25 = scalar_select %p2814_p10, 1, 0 }
  0x97   : > { %s3157_s26 = sld [smem:[#allocation22_spill]]  ;;  %s513_s0 = scalar_lea.vmem [#allocation2], %s2818_s17 }
  0x98   : > { %s520_s11 = sshll.u32 %s513_s0, 4  ;;  %p2831_p11 = pnand %p2200_p9, %p2797_p0  ;;  %s2827_s11 = int_to_ptr.vmem [resolvable:$true] %s520_s11 }
  0x99   : > { %s2838_s30 = scalar_lea.hbm %s3107_s1, %s1943_s15  ;;  %s527_s18 = sand.u32 1, %s2527_s24  }
  0x9a   : > { %s510_s6 = scalar_lea.sflag [#allocation3], %s509_s14  ;;  %p2387_p1 = pneg %p2831_p11 }
  0x9d   : > { %s2824_s10 = scalar_lea.hbm %s3157_s26, %s1943_s15  ;;  %s2390_s19 = scalar_lea.hbm %s3157_s26, 256 }
  0x9e   : > { %s2385_s8 = scalar_lea.hbm %s2824_s10, 128  ;;  %p2391_p13 = scmp.lt.u32.totalorder %s2824_s10, %s3157_s26 }
  0x9f   : > { %p2386_p12 = scmp.ne.s32.totalorder %s2824_s10, %s2385_s8  ;;  %p2392_p0 = scmp.lt.u32.totalorder %s2390_s19, %s2385_s8 }
  0xa0   : > { %p2394_p5 = scmp.lt.u32.totalorder %s2385_s8, %s2824_s10 }
  0xa1   : > { %p2388_p3 = pnand %p2387_p1, %p2386_p12  ;;  %p2393_p2 = por %p2392_p0, %p2391_p13 }
  0xa3   : > { %p2389_p8 = pneg %p2388_p3  ;;  %p2395_p7 = por %p2394_p5, %p2393_p2 }
  0xa5   : > { %p2396_p9 = pnand %p2395_p7, %p2389_p8 }
  0xa7   : > { %2399 = shalt.err (!%p2396_p9)
}
  0xa8   : > { %s2400_s4 = scalar_lea.vmem %s2827_s11, 128  ;;  %s2535_s14 = smov [#allocation2]  }
  0xa9   : > { %p2401_p12 = scmp.ne.s32.totalorder %s2827_s11, %s2400_s4  ;;  %s2405_s15 = sshll.u32 %s2535_s14, 4  ;;  %s2406_s15 = int_to_ptr.vmem [resolvable:$false] %s2405_s15 }
  0xaa   : > { %s2407_s23 = scalar_lea.vmem %s2406_s15, 256  ;;  %p2408_p4 = scmp.lt.s32.totalorder %s2827_s11, %s2406_s15 }
  0xab   : > { %p2403_p3 = pnand %p2401_p12, %p2387_p1  ;;  %p2409_p13 = scmp.lt.s32.totalorder %s2407_s23, %s2400_s4 }
  0xad   : > { %p2404_p10 = pneg %p2403_p3  ;;  %p2410_p0 = por %p2409_p13, %p2408_p4 }
  0xaf   : > { %p2411_p2 = pnand %p2410_p0, %p2404_p10 }
  0xb1   : > { %2414 = shalt.err (!%p2411_p2)
}
  0xb2   : > { %2188 = dma.hbm_to_vmem [thread:$0]  (!%p2831_p11), %s2824_s10, 128, %s2827_s11, %s510_s6  }
  0xb3   : > { %s531_s8 = scalar_lea.vmem [#allocation5], %s2818_s17  ;;  %s528_s20 = scalar_lea.sflag [#allocation6], %s527_s18 }
  0xb4   : > { %s538_s19 = sshll.u32 %s531_s8, 4  ;;  %s2415_s0 = scalar_lea.hbm %s2838_s30, 128  ;;  %s539_s19 = int_to_ptr.vmem [resolvable:$true] %s538_s19 }
  0xb5   : > { %p2416_p4 = scmp.ne.s32.totalorder %s2838_s30, %s2415_s0  ;;  %s2420_s14 = scalar_lea.hbm %s3107_s1, 256 }
  0xb6   : > { %p2421_p5 = scmp.lt.u32.totalorder %s2838_s30, %s3107_s1  ;;  %p2422_p7 = scmp.lt.u32.totalorder %s2420_s14, %s2415_s0 }
  0xb7   : > { %p2418_p10 = pnand %p2416_p4, %p2387_p1  ;;  %p2424_p12 = scmp.lt.u32.totalorder %s2415_s0, %s2838_s30 }
  0xb8   : > { %p2423_p9 = por %p2422_p7, %p2421_p5 }
  0xb9   : > { %p2419_p8 = pneg %p2418_p10 }
  0xba   : > { %p2425_p3 = por %p2424_p12, %p2423_p9 }
  0xbc   : > { %p2426_p13 = pnand %p2425_p3, %p2419_p8 }
  0xbe   : > { %2429 = shalt.err (!%p2426_p13)
}
  0xbf   : > { %s2430_s6 = scalar_lea.vmem %s539_s19, 128  ;;  %s2536_s17 = smov [#allocation5]  }
  0xc0   : > { %p2431_p0 = scmp.ne.s32.totalorder %s539_s19, %s2430_s6  ;;  %s2435_s10 = sshll.u32 %s2536_s17, 4  ;;  %s2436_s10 = int_to_ptr.vmem [resolvable:$false] %s2435_s10 }
  0xc1   : > { %s2437_s11 = scalar_lea.vmem %s2436_s10, 256  ;;  %p2438_p10 = scmp.lt.s32.totalorder %s539_s19, %s2436_s10 }
  0xc2   : > { %p2433_p2 = pnand %p2431_p0, %p2387_p1  ;;  %p2439_p6 = scmp.lt.s32.totalorder %s2437_s11, %s2430_s6 }
  0xc4   : > { %p2434_p4 = pneg %p2433_p2  ;;  %p2440_p5 = por %p2439_p6, %p2438_p10 }
  0xc6   : > { %p2441_p7 = pnand %p2440_p5, %p2434_p4 }
  0xc8   : > { %2444 = shalt.err (!%p2441_p7)
}
  0xc9   : > { %2191 = dma.hbm_to_vmem [thread:$0]  (!%p2831_p11), %s2838_s30, 128, %s539_s19, %s528_s20  }
  0xca   : > { %p3159_p8 = scmp.ne.s32.totalorder %s3144_s28, 0 }
  0xcb   : > { %s2891_s18 = sand.u32 (!%p3159_p8), 1, %s2519_s22   ;;  %p3160_p6 = scmp.ne.s32.totalorder (!%p3159_p8), %s3154_s16, 0 }
  0xcc   : > { %547 = sbr.rel (%p3159_p8) target bundleno = 2506 (0x9ca), region = 84  ;;  %s2894_s8 = sshll.u32 (!%p3159_p8), %s2891_s18, 3 }
  0xcd   : > { %s550_s0 = scalar_lea.sflag (!%p3159_p8), [#allocation3], %s2891_s18  ;;  %s553_s2 = scalar_lea.vmem (!%p3159_p8), [#allocation2], %s2894_s8 }
  0xd3   : > { %2490 = dma.done.wait (%p3160_p6), %s550_s0, 128  }
  0xd4   : > { %2492 = vsyncadd (%p3160_p6), %s550_s0, 4294967168  ;;  %s558_s28 = sand.u32 1, %s2653_s27   ;;  %s562_s30 = scalar_lea.vmem [#allocation5], %s2894_s8 }
  0xd5   : > { %s559_s13 = scalar_lea.sflag [#allocation6], %s558_s28 }
  0xd6   : > { %2494 = dma.done.wait (%p3160_p6), %s559_s13, 128  }
  0xd7   : > { %2496 = vsyncadd (%p3160_p6), %s559_s13, 4294967168  ;;  %p3161_p11 = scmp.eq.s32.totalorder %s2653_s27, 0 }
  0xd9   : > { %2498 = dma.done.wait (%p3161_p11), [#allocation6], 512   ;;  %p3162_p1 = pmov %p3161_p11 }
  0xdb   : > { %2500 = vsyncadd (%p3162_p1), [#allocation6], 4294966784  ;;  %p3163_p9 = pmov %p3162_p1 }
  0xdc   : > { %p3164_p12 = pmov %p3162_p1 }
  0xdd   : > { %2502 = dma.done.wait (%p3163_p9), [#allocation9], 1024  }
  0xde   : > { %2504 = vsyncadd (%p3164_p12), [#allocation9], 4294966272  ;;  %p3165_p3 = pmov %p3162_p1 }
  0xdf   : > { %p3166_p13 = pmov %p3162_p1 }
  0xe0   : > { %2506 = dma.done.wait (%p3165_p3), [#allocation12], 512  }
  0xe1   : > { %2508 = vsyncadd (%p3166_p13), [#allocation12], 4294966784  ;;  %v2537_v0 = vmov 0.0|0.0   ;;  %vm2538_vm0 = vmmov 0   ;;  %v2539_v1 = vmov 0.0   ;;  %v720_v2 = vld [vmem:[#allocation8] sm:$0xff] }
  0xe2   : > { %2126 = vmatprep.subr.bf16.mxu1 %v2537_v0  ;;  %2120 = vmatprep.subr.bf16.mxu0 %v2537_v0  ;;  %v721_v3 = vld [vmem:[#allocation8 + $0x8] sm:$0xff]  ;;  %v634_v4 = vld [vmem:[#allocation7] sm:$0xff]  ;;  %v722_v7 = vld [vmem:[#allocation8 + $0x10] sm:$0xff]  ;;  %vm645_vm1 = vcmask 261120   ;;  %vm885_vm2 = vcmask 64512   ;;  %s2540_s14 = smov 112  }
  0xe3   : > { %2044 = vmatprep.mubr.msk.f32.mxu1 %vm2538_vm0, %v2539_v1  ;;  %2033 = vmatprep.mubr.msk.f32.mxu0 %vm2538_vm0, %v2539_v1  ;;  %v2127_v5 = vpack.c.bf16 %v721_v3, %v720_v2  ;;  %v635_v6 = vld [vmem:[#allocation7 + $0x8] sm:$0xff]  ;;  %v723_v8 = vld [vmem:[#allocation8 + $0x18] sm:$0xff]  ;;  %v636_v10 = vld [vmem:[#allocation7 + $0x10] sm:$0xff]  ;;  %s2541_s15 = smov 120   ;;  %s2542_s23 = smov 104   ;;  %vm1555_vm3 = vcmask 130048  }
  0xe4   : > { %v2121_v9 = vpack.c.bf16 %v635_v6, %v634_v4  ;;  %v637_v11 = vld [vmem:[#allocation7 + $0x18] sm:$0xff]  ;;  %v2130_v12 = vpack.c.bf16 %v723_v8, %v722_v7  ;;  %v2932_v15 = vld [vmem:[%s553_s2] sm:$0xff]  ;;  %v806_v18 = vld [vmem:[#allocation10 + $0x10] sm:$0xff]  ;;  %s2543_s10 = smov 8   ;;  %s2544_s11 = smov 16   ;;  %vm1557_vm4 = vcmask 195584  }
  0xe5   : > { %2128 = vmatpush3.bf16.msra.mxu1 %v2127_v5  ;;  %v2124_v13 = vpack.c.bf16 %v637_v11, %v636_v10  ;;  %v633_v14 = vld [vmem:[%s562_s30] sm:$0xff]  ;;  %v804_v16 = vld [vmem:[#allocation10] sm:$0xff]  ;;  %v805_v17 = vld [vmem:[#allocation10 + $0x8] sm:$0xff]  ;;  %s2545_s0 = smov 24   ;;  %s3167_s16 = sld [smem:[#allocation29_spill]] }
  0xe6   : > { %2122 = vmatpush3.bf16.msra.mxu0 %v2121_v9  ;;  %2129 = vmatprep.subr.bf16.mxu1 %v2537_v0  ;;  %v2133_v19 = vpack.c.bf16 %v805_v17, %v804_v16  ;;  %v807_v20 = vld [vmem:[#allocation10 + $0x18] sm:$0xff]  ;;  %v1956_v22 = vld [vmem:[%s3111_s5] ss:$0 sm:$0xff]  ;;  %s3169_s2 = sld [smem:[#allocation28_spill]]  ;;  %s3170_s30 = sld [smem:[#allocation30_spill]] }
  0xe7   : > { %2123 = vmatprep.subr.bf16.mxu0 %v2537_v0  ;;  %v2136_v21 = vpack.c.bf16 %v807_v20, %v806_v18  ;;  %v1954_v23 = vld [vmem:[%s3109_s3] ss:$0 sm:$0xff]  ;;  %s3171_s4 = sld [smem:[#allocation31_spill]]  ;;  %s1981_s6 = sshll.u32 %s2653_s27, 7 }
  0xe8   : > { %v1958_v31 = vld [vmem:[%s3113_s7] ss:$0 sm:$0xff]  ;;  %s631_s17 = scalar_lea.vmem [#allocation13], %s2894_s8  ;;  %s1791_s13 = scalar_lea.sflag [#allocation4], %s2891_s18 }
  0xe9   : > { %2131 = vmatpush3.bf16.msra.mxu1 %v2130_v12  ;;  %p3174_p2 = scmp.ne.s32.totalorder %s3155_s12, 0  ;;  %s2546_s27 = smov [#allocation13]  }
  0xea   : > { %2125 = vmatpush3.bf16.msra.mxu0 %v2124_v13  ;;  %2058 = vmatprep.subr.mxu1 %v2539_v1  ;;  %s2449_s8 = sshll.u32 %s2546_s27, 4  ;;  %s2450_s8 = int_to_ptr.vmem [resolvable:$false] %s2449_s8 }
  0xeb   : > { %2132 = vmatprep.subr.bf16.mxu0 %v2537_v0  ;;  %s2451_s19 = scalar_lea.vmem %s2450_s8, 256 }
  0xec   : > { %2045 = vmatmul.mubr.msk.f32.vlgmr.msra.gmra.mrb[0].mxu1 %vm645_vm1, %v633_v14 }
  0xed   : > { %2034 = vmatmul.mubr.msk.f32.vlgmr.msra.gmra.mrb[0].mxu0 %vm645_vm1, %v2932_v15  ;;  %2060 = vmatprep.mubr.msk.f32.mxu1 %vm2538_vm0, %v2539_v1 }
  0xee   : > { %2055 = vmatprep.mubr.msk.f32.mxu0 %vm2538_vm0, %v2539_v1  ;;  %2134 = vmatpush3.bf16.msra.mxu0 %v2133_v19 }
  0xef   : > { %2135 = vmatprep.subr.bf16.mxu0 %v2537_v0 }
  0xf2   : > { %2137 = vmatpush3.bf16.msra.mxu0 %v2136_v21 }
  0xf3   : > { %2068 = vmatprep.subr.mxu0 %v2539_v1 }
  0xf5   : > { %2056 = vmatmul.mubr.msk.f32.vlgmr.msra.gmra.mrb[2].mxu0 %vm645_vm1, %v633_v14 }
  0xf6   : > { %2070 = vmatprep.mubr.msk.f32.mxu0 %vm2538_vm0, %v2539_v1 }
 0x1bf   : > { %v800_v24 = vpop.f32.mrb[0].mxu1 }
 0x1c0   : > { %v801_v25 = vadd.f32 %v1956_v22, %v800_v24  ;;  %v715_v26 = vpop.f32.mrb[0].mxu0  ;;  %v2046_v27 = vpop.f32.mrb[1].mxu1 }
 0x1c1   : > { %v716_v28 = vadd.f32 %v1954_v23, %v715_v26  ;;  %v2035_v29 = vpop.f32.mrb[1].mxu0 }
 0x1c2   : > { %1214 = vrot.lane.b32.xlu1 %v801_v25, %s2540_s14  ;;  %1048 = vrot.lane.b32.xlu0 %v801_v25, %s2541_s15  ;;  %v1559_v29 = vld [vmem:[#allocation11] sm:$0xff] }
 0x1c3   : > { %v719_v30 = vmul.f32 0.35355338, %v716_v28  ;;  %2059 = vmatpush3.xpose.msk.msra.mxu1 %vm885_vm2, %v801_v25 }
 0x1c4   : > { %2063 = vmatprep.subr.mxu1 %v2539_v1 }
 0x1c6   : > { %2061 = vmatmul.mubr.msk.f32.vlgmr.msra.gmra.mrb[2].mxu1 %vm885_vm2, %v719_v30  ;;  %1212 = vrot.lane.b32.xlu1 %v719_v30, %s2540_s14 }
 0x1c7   : > { %1046 = vrot.lane.b32.xlu0 %v719_v30, %s2541_s15  ;;  %2065 = vmatprep.mubr.msk.f32.mxu1 %vm2538_vm0, %v2539_v1 }
 0x1c8   : > { %v881_v32 = vpop.f32.mrb[2].mxu0 }
 0x1c9   : > { %v2968_v33 = vadd.f32 %v1958_v31, %v881_v32  ;;  %v2057_v34 = vpop.f32.mrb[3].mxu0  ;;  %v1561_v32 = vld [vmem:[#allocation11 + $0x10] sm:$0xff] }
 0x1ca   : > { %1377 = vrot.lane.b32.xlu1 %v719_v30, %s2542_s23  ;;  %v1560_v30 = vld [vmem:[#allocation11 + $0x8] sm:$0xff] }
 0x1cb   : > { %1379 = vrot.lane.b32.xlu0 %v801_v25, %s2542_s23  ;;  %2064 = vmatpush3.msra.mxu1 %v2968_v33  ;;  %v2139_v31 = vpack.c.bf16 %v1560_v30, %v1559_v29 }
 0x1cc   : > { %2073 = vmatprep.subr.mxu1 %v2539_v1 }
 0x234   : > { %v1049_v35 = vpop.permute.xlu0 %1048  ;;  %v1215_v36 = vpop.permute.xlu1 %1214 }
 0x235   : > { %2069 = vmatpush3.xpose.msk.msra.mxu0 %vm885_vm2, %v1049_v35 }
 0x236   : > { %2078 = vmatprep.subr.mxu0 %v2539_v1 }
 0x238   : > { %v1213_v38 = vpop.permute.xlu1 %1212 }
 0x239   : > { %v1047_v37 = vpop.permute.xlu0 %1046 }
 0x23a   : > { %2071 = vmatmul.mubr.msk.f32.vlgmr.msra.gmra.mrb[4].mxu0 %vm885_vm2, %v1047_v37 }
 0x23b   : > { %2079 = vmatpush3.xpose.msk.msra.mxu0 %vm885_vm2, %v1215_v36  ;;  %2080 = vmatprep.mubr.msk.f32.mxu0 %vm2538_vm0, %v2539_v1 }
 0x23c   : > { %2088 = vmatprep.subr.mxu0 %v2539_v1  ;;  %v1378_v40 = vpop.permute.xlu1 %1377 }
 0x23d   : > { %v1380_v39 = vpop.permute.xlu0 %1379 }
 0x23e   : > { %2081 = vmatmul.mubr.msk.f32.vlgmr.msra.gmra.mrb[6].mxu0 %vm885_vm2, %v1213_v38 }
 0x23f   : > { %2089 = vmatpush3.xpose.msk.msra.mxu0 %vm885_vm2, %v1380_v39  ;;  %2090 = vmatprep.mubr.msk.f32.mxu0 %vm2538_vm0, %v2539_v1 }
 0x240   : > { %2138 = vmatprep.subr.bf16.mxu0 %v2537_v0 }
 0x242   : > { %2091 = vmatmul.mubr.msk.f32.vlgmr.msra.gmra.mrb[8].mxu0 %vm885_vm2, %v1378_v40 }
 0x243   : > { %2106 = vmatprep.mubr.msk.f32.mxu0 %vm2538_vm0, %v2539_v1  ;;  %2140 = vmatpush3.bf16.msra.mxu0 %v2139_v31 }
 0x244   : > { %2141 = vmatprep.subr.bf16.mxu0 %v2537_v0 }
 0x299   : > { %v958_v41 = vpop.f32.mrb[2].mxu1 }
 0x29a   : > { %v2062_v42 = vpop.f32.mrb[3].mxu1  ;;  %v962_v43 = vsel %vm885_vm2, %v958_v41, -inf }
 0x29b   : > { %963 = vmax.xlane.f32.xlu0 %v962_v43 }
 0x30d   : > { %v1120_v44 = vpop.f32.mrb[4].mxu0 }
 0x30e   : > { %v2072_v45 = vpop.f32.mrb[5].mxu0  ;;  %v1124_v46 = vsel %vm885_vm2, %v1120_v44, -inf }
 0x30f   : > { %1125 = vmax.xlane.f32.xlu1 %v1124_v46  ;;  %v1972_v46 = vld [vmem:[%s3115_s9] ss:$0 sm:$0xff] }
 0x311   : > { %v1286_v47 = vpop.f32.mrb[6].mxu0 }
 0x312   : > { %v2082_v48 = vpop.f32.mrb[7].mxu0  ;;  %v1290_v49 = vsel %vm885_vm2, %v1286_v47, -inf }
 0x313   : > { %1291 = vmax.xlane.f32.xlu0 %v1290_v49 }
 0x315   : > { %v1451_v50 = vpop.f32.mrb[8].mxu0 }
 0x316   : > { %v2092_v51 = vpop.f32.mrb[9].mxu0  ;;  %v1455_v52 = vsel %vm885_vm2, %v1451_v50, -inf }
 0x317   : > { %1456 = vmax.xlane.f32.xlu0 %v1455_v52 }
 0x320   : > { %1136 = vrot.lane.b32.xlu1 %v2968_v33, %s2541_s15 }
 0x328   : > { %v964_v53 = vpop.xlane.xlu0 %963 }
 0x329   : > { %v965_v54 = vsub.f32 %v958_v41, %v964_v53 }
 0x32b   : > { %v966_v55 = vmul.f32 1.442695, %v965_v54 }
 0x32d   : > { %2253 = vpow2.f32 %v966_v55 }
 0x337   : > { %v2254_v56 = vpop.eup %2253 }
 0x338   : > { %v968_v57 = vsel %vm885_vm2, %v2254_v56, 0.0 }
 0x344   : > { %969 = vadd.xlane.f32.xlu1 %v968_v57  ;;  %v1674_v57 = vld [vmem:[%s3167_s16] sm:$0xff] }
 0x39c   : > { %v1126_v58 = vpop.xlane.xlu1 %1125 }
 0x39d   : > { %v1127_v59 = vsub.f32 %v1120_v44, %v1126_v58  ;;  %v1675_v58 = vld [vmem:[%s3167_s16 + $0x8] sm:$0xff] }
 0x39f   : > { %v1128_v60 = vmul.f32 1.442695, %v1127_v59  ;;  %v2145_v59 = vpack.c.bf16 %v1675_v58, %v1674_v57 }
 0x3a0   : > { %v1292_v61 = vpop.xlane.xlu0 %1291  ;;  %v1137_v11 = vpop.permute.xlu1 %1136 }
 0x3a1   : > { %2255 = vpow2.f32 %v1128_v60  ;;  %v1293_v62 = vsub.f32 %v1286_v47, %v1292_v61  ;;  %v1677_v60 = vld [vmem:[%s3167_s16 + $0x18] sm:$0xff] }
 0x3a3   : > { %v1294_v63 = vmul.f32 1.442695, %v1293_v62 }
 0x3a4   : > { %v1457_v2 = vpop.xlane.xlu0 %1456 }
 0x3a5   : > { %2257 = vpow2.f32 %v1294_v63  ;;  %v1458_v3 = vsub.f32 %v1451_v50, %v1457_v2 }
 0x3a7   : > { %v1459_v4 = vmul.f32 1.442695, %v1458_v3 }
 0x3a9   : > { %2259 = vpow2.f32 %v1459_v4 }
 0x3ab   : > { %v2256_v5 = vpop.eup %2255 }
 0x3ac   : > { %v1130_v6 = vsel %vm885_vm2, %v2256_v5, 0.0 }
 0x3ad   : > { %1131 = vadd.xlane.f32.xlu0 %v1130_v6 }
 0x3af   : > { %v2258_v7 = vpop.eup %2257 }
 0x3b0   : > { %v1296_v8 = vsel %vm885_vm2, %v2258_v7, 0.0 }
 0x3b1   : > { %1297 = vadd.xlane.f32.xlu1 %v1296_v8  ;;  %v1976_v8 = vld [vmem:[%s3170_s30] ss:$0 sm:$0xff] }
 0x3b3   : > { %v2260_v9 = vpop.eup %2259 }
 0x3b4   : > { %v1461_v10 = vsel %vm885_vm2, %v2260_v9, 0.0 }
 0x3b5   : > { %1462 = vadd.xlane.f32.xlu0 %v1461_v10 }
 0x3c2   : > { %1466 = vrot.lane.b32.xlu1 %v2968_v33, %s2542_s23  ;;  %s3172_s23 = sld [smem:[#allocation32_spill]] }
 0x3cb   : > { %1301 = vrot.lane.b32.xlu0 %v2968_v33, %s2540_s14  ;;  %v1562_v33 = vld [vmem:[#allocation11 + $0x18] sm:$0xff] }
 0x3cc   : > { %v2142_v34 = vpack.c.bf16 %v1562_v33, %v1561_v32 }
 0x3ce   : > { %2143 = vmatpush3.bf16.msra.mxu0 %v2142_v34 }
 0x3d1   : > { %v970_v12 = vpop.xlane.xlu1 %969 }
 0x3d2   : > { %2261 = vrcp.f32 %v970_v12 }
 0x3dc   : > { %v2262_v13 = vpop.eup %2261 }
 0x3dd   : > { %v972_v14 = vmul.f32 %v2262_v13, %v2254_v56 }
 0x3df   : > { %2066 = vmatmul.mubr.msk.f32.vlgmr.msra.gmra.mrb[4].mxu1 %vm885_vm2, %v972_v14 }
 0x3e0   : > { %2074 = vmatpush3.msra.mxu1 %v1137_v11  ;;  %2075 = vmatprep.mubr.msk.f32.mxu1 %vm2538_vm0, %v2539_v1 }
 0x3e1   : > { %2083 = vmatprep.subr.mxu1 %v2539_v1 }
 0x43a   : > { %v1132_v16 = vpop.xlane.xlu0 %1131 }
 0x43b   : > { %2263 = vrcp.f32 %v1132_v16 }
 0x43e   : > { %v1298_v17 = vpop.xlane.xlu1 %1297 }
 0x43f   : > { %2265 = vrcp.f32 %v1298_v17 }
 0x442   : > { %v1463_v18 = vpop.xlane.xlu0 %1462  ;;  %v1467_v24 = vpop.permute.xlu1 %1466 }
 0x443   : > { %2267 = vrcp.f32 %v1463_v18 }
 0x445   : > { %v2264_v19 = vpop.eup %2263 }
 0x446   : > { %v1134_v20 = vmul.f32 %v2264_v19, %v2256_v5  ;;  %v1302_v21 = vpop.permute.xlu0 %1301  ;;  %v1975_v5 = vld [vmem:[%s3169_s2] ss:$0 sm:$0xff]  ;;  %s3173_s2 = sld [smem:[#allocation33_spill]] }
 0x448   : > { %2076 = vmatmul.mubr.msk.f32.vlgmr.msra.gmra.mrb[6].mxu1 %vm885_vm2, %v1134_v20 }
 0x449   : > { %v2266_v22 = vpop.eup %2265  ;;  %2084 = vmatpush3.msra.mxu1 %v1302_v21  ;;  %2085 = vmatprep.mubr.msk.f32.mxu1 %vm2538_vm0, %v2539_v1 }
 0x44a   : > { %v1300_v23 = vmul.f32 %v2266_v22, %v2258_v7  ;;  %2093 = vmatprep.subr.mxu1 %v2539_v1 }
 0x44c   : > { %2086 = vmatmul.mubr.msk.f32.vlgmr.msra.gmra.mrb[8].mxu1 %vm885_vm2, %v1300_v23  ;;  %s3061_s28 = scalar_lea.hbm %s3173_s2, %s1981_s6 }
 0x44d   : > { %v2268_v25 = vpop.eup %2267  ;;  %2094 = vmatpush3.msra.mxu1 %v1467_v24  ;;  %2095 = vmatprep.mubr.msk.f32.mxu1 %vm2538_vm0, %v2539_v1 }
 0x44e   : > { %v1465_v26 = vmul.f32 %v2268_v25, %v2260_v9  ;;  %2144 = vmatprep.subr.bf16.mxu1 %v2537_v0  ;;  %v1978_v25 = vld [vmem:[%s3171_s4] ss:$0 sm:$0xff] }
 0x450   : > { %2096 = vmatmul.mubr.msk.f32.vlgmr.msra.gmra.mrb[10].mxu1 %vm885_vm2, %v1465_v26 }
 0x451   : > { %2117 = vmatprep.mubr.msk.f32.mxu1 %vm2538_vm0, %v2539_v1  ;;  %2146 = vmatpush3.bf16.msra.mxu1 %v2145_v59 }
 0x452   : > { %2147 = vmatprep.subr.bf16.mxu1 %v2537_v0 }
 0x4b2   : > { %v1042_v27 = vpop.f32.mrb[4].mxu1 }
 0x4b3   : > { %v2067_v28 = vpop.f32.mrb[5].mxu1 }
 0x51b   : > { %v1208_v35 = vpop.f32.mrb[6].mxu1 }
 0x51c   : > { %1543 = vrot.lane.b32.xlu1 %v1208_v35, %s2543_s10  ;;  %v2077_v36 = vpop.f32.mrb[7].mxu1  ;;  %s3168_s10 = sld [smem:[#allocation27_spill]] }
 0x51f   : > { %v1373_v37 = vpop.f32.mrb[8].mxu1 }
 0x520   : > { %1547 = vrot.lane.b32.xlu0 %v1373_v37, %s2544_s11  ;;  %v2087_v1 = vpop.f32.mrb[9].mxu1 }
 0x522   : > { %v1974_v4 = vld [vmem:[%s3168_s10] ss:$0 sm:$0xff]  ;;  %s1804_s10 = sshll.u32 %s631_s17, 4  ;;  %s3063_s10 = int_to_ptr.vmem [resolvable:$true] %s1804_s10 }
 0x523   : > { %v1538_v38 = vpop.f32.mrb[10].mxu1  ;;  %s2445_s30 = scalar_lea.vmem %s3063_s10, 128  ;;  %p2452_p5 = scmp.lt.s32.totalorder %s3063_s10, %s2450_s8 }
 0x524   : > { %1551 = vrot.lane.b32.xlu1 %v1538_v38, %s2545_s0  ;;  %v2097_v39 = vpop.f32.mrb[11].mxu1  ;;  %p2446_p0 = scmp.ne.s32.totalorder %s3063_s10, %s2445_s30  ;;  %p2453_p7 = scmp.lt.s32.totalorder %s2451_s19, %s2445_s30 }
 0x526   : > { %p2447_p4 = pnand %p2446_p0, %p3174_p2  ;;  %p2454_p8 = por %p2453_p7, %p2452_p5 }
 0x528   : > { %p2448_p10 = pneg %p2447_p4 }
 0x52a   : > { %p2455_p6 = pnand %p2454_p8, %p2448_p10 }
 0x58e   : > { %v1544_v40 = vpop.permute.xlu1 %1543 }
 0x58f   : > { %v1554_v42 = vsel %vm885_vm2, %v1042_v27, %v1544_v40  ;;  %v1979_v27 = vld [vmem:[%s3172_s23] ss:$0 sm:$0xff] }
 0x592   : > { %v1548_v41 = vpop.permute.xlu0 %1547 }
 0x593   : > { %v1556_v43 = vsel %vm1555_vm3, %v1554_v42, %v1548_v41 }
 0x596   : > { %v1552_v44 = vpop.permute.xlu1 %1551 }
 0x597   : > { %v1558_v45 = vsel %vm1557_vm4, %v1556_v43, %v1552_v44 }
 0x598   : > { %2107 = vmatmul.mubr.msk.f32.vlgmr.msra.gmra.mrb[10].mxu0 %vm645_vm1, %v1558_v45 }
 0x66b   : > { %v1639_v47 = vpop.f32.mrb[10].mxu0 }
 0x66c   : > { %v1640_v48 = vadd.f32 %v1972_v46, %v1639_v47  ;;  %v2108_v49 = vpop.f32.mrb[11].mxu0 }
 0x66e   : > { %v1643_v50 = vadd.f32 %v1640_v48, %v2932_v15  ;;  %v1676_v15 = vld [vmem:[%s3167_s16 + $0x10] sm:$0xff] }
 0x66f   : > { %v2148_v61 = vpack.c.bf16 %v1677_v60, %v1676_v15 }
 0x670   : > { %v1646_v51 = vsel %vm645_vm1, %v1643_v50, 0.0 }
 0x671   : > { %1647 = vadd.xlane.f32.xlu0 %v1646_v51  ;;  %2149 = vmatpush3.bf16.msra.mxu1 %v2148_v61 }
 0x6fe   : > { %v1648_v52 = vpop.xlane.xlu0 %1647 }
 0x6ff   : > { %v1650_v53 = vmul.f32 0.03125, %v1648_v52 }
 0x701   : > { %v1651_v54 = vsub.f32 %v1643_v50, %v1650_v53 }
 0x703   : > { %v1652_v55 = vmul.f32 %v1651_v54, %v1651_v54 }
 0x705   : > { %v1653_v56 = vsel %vm645_vm1, %v1652_v55, 0.0 }
 0x706   : > { %1654 = vadd.xlane.f32.xlu1 %v1653_v56 }
 0x793   : > { %v1655_v62 = vpop.xlane.xlu1 %1654 }
 0x794   : > { %v1656_v63 = vmul.f32 0.03125, %v1655_v62 }
 0x796   : > { %v1657_v2 = vadd.f32 1e-05, %v1656_v63 }
 0x798   : > { %2269 = vrsqrt.f32 %v1657_v2 }
 0x7a2   : > { %v2270_v3 = vpop.eup %2269 }
 0x7a3   : > { %v1659_v0 = vmul.f32 %v2270_v3, %v1651_v54 }
 0x7a5   : > { %v1666_v6 = vmul.f32 %v1974_v4, %v1659_v0 }
 0x7a7   : > { %v1673_v7 = vadd.f32 %v1975_v5, %v1666_v6 }
 0x7a9   : > { %2118 = vmatmul.mubr.msk.f32.vlgmr.msra.gmra.mrb[12].mxu1 %vm645_vm1, %v1673_v7 }
 0x87c   : > { %v1754_v9 = vpop.f32.mrb[12].mxu1 }
 0x87d   : > { %v1755_v10 = vadd.f32 %v1976_v8, %v1754_v9  ;;  %v2119_v11 = vpop.f32.mrb[13].mxu1 }
 0x87f   : > { %v1758_v12 = vmax.f32 %v1755_v10, 0.0 }
 0x881   : > { %v1759_v13 = vadd.f32 %v1758_v12, %v1673_v7 }
 0x883   : > { %v1762_v14 = vsel %vm645_vm1, %v1759_v13, 0.0 }
 0x884   : > { %1763 = vadd.xlane.f32.xlu0 %v1762_v14 }
 0x911   : > { %v1764_v16 = vpop.xlane.xlu0 %1763 }
 0x912   : > { %v1765_v17 = vmul.f32 0.03125, %v1764_v16 }
 0x914   : > { %v1766_v18 = vsub.f32 %v1759_v13, %v1765_v17 }
 0x916   : > { %v1767_v19 = vmul.f32 %v1766_v18, %v1766_v18 }
 0x918   : > { %v1768_v20 = vsel %vm645_vm1, %v1767_v19, 0.0 }
 0x919   : > { %1769 = vadd.xlane.f32.xlu0 %v1768_v20 }
 0x9a6   : > { %v1770_v21 = vpop.xlane.xlu0 %1769 }
 0x9a7   : > { %v1771_v22 = vmul.f32 0.03125, %v1770_v21 }
 0x9a9   : > { %v1772_v23 = vadd.f32 1e-05, %v1771_v22 }
 0x9ab   : > { %2271 = vrsqrt.f32 %v1772_v23 }
 0x9b5   : > { %v2272_v24 = vpop.eup %2271 }
 0x9b6   : > { %v1774_v26 = vmul.f32 %v2272_v24, %v1766_v18 }
 0x9b8   : > { %v1781_v28 = vmul.f32 %v1978_v25, %v1774_v26 }
 0x9ba   : > { %v1788_v29 = vadd.f32 %v1979_v27, %v1781_v28 }
 0x9bc   : > { %1789 = vst.msk [vmem:[%s631_s17] sm:$0xff] %vm645_vm1, %v1788_v29 }
 0x9bd   : > { %2458 = shalt.err (!%p2455_p6)
}
 0x9be   : > { %s2459_s18 = scalar_lea.hbm %s3061_s28, 128  ;;  %s2463_s14 = scalar_lea.hbm %s3173_s2, 256 }
 0x9bf   : > { %p2460_p11 = scmp.ne.s32.totalorder %s3061_s28, %s2459_s18  ;;  %p2464_p12 = scmp.lt.u32.totalorder %s3061_s28, %s3173_s2 }
 0x9c0   : > { %p2465_p3 = scmp.lt.u32.totalorder %s2463_s14, %s2459_s18  ;;  %p2467_p0 = scmp.lt.u32.totalorder %s2459_s18, %s3061_s28 }
 0x9c1   : > { %p2461_p1 = pnand %p2460_p11, %p3174_p2 }
 0x9c2   : > { %p2466_p13 = por %p2465_p3, %p2464_p12 }
 0x9c3   : > { %p2462_p9 = pneg %p2461_p1 }
 0x9c4   : > { %p2468_p4 = por %p2467_p0, %p2466_p13 }
 0x9c6   : > { %p2469_p10 = pnand %p2468_p4, %p2462_p9 }
 0x9c8   : > { %2472 = shalt.err (!%p2469_p10)
}
 0x9c9   : > { %2170 = dma.vmem_to_hbm [thread:$0]  (%p3174_p2), %s3063_s10, 128, %s3061_s28, %s1791_s13  }
 0x9ca PF: > { %s1816_s6 = sand.u32 1, %s2515_s21   ;;  %p3175_p5 = scmp.ne.s32.totalorder %s3156_s25, 0 }
 0x9cb   : > { %p3176_p7 = scmp.ge.s32.totalorder %s2527_s24, 2  ;;  %s1817_s17 = scalar_lea.sflag [#allocation4], %s1816_s6 }
 0x9cd   : > { %p2193_p8 = pnand %p3176_p7, %p3175_p5 }
 0x9cf   : > { %2510 = dma.done.wait (!%p2193_p8), %s1817_s17, 128  }
 0x9d0   : > { %2512 = vsyncadd (!%p2193_p8), %s1817_s17, 4294967168  ;;  %s3177_s11 = sld [smem:[#allocation20_spill]]  ;;  %s3178_s23 = sld [smem:[#allocation21_spill]] }
 0x9d1   : > { %p34_p6 = scmp.ge.s32.totalorder %s2784_s29, 4   ;;  %s3179_s21 = smov %s2519_s22 }
 0x9d2   : > { %s3181_s24 = smov %s2784_s29 }
 0x9d3   :  { %36 = sbr.rel (!%p34_p6) target bundleno = 22 (0x16), region = 158 }
 0x9d6   : > { %s3180_s22 = smov %s3177_s11 }
 0x9da   :  { %1822 = vsyncpa [#allocation3], 1 }
 0x9db   :  { %1824 = vsyncpa [#allocation3 + $0x1], 1 }
 0x9dc   :  { %1825 = vsyncpa [#allocation6], 1 }
 0x9dd   :  { %1827 = vsyncpa [#allocation6 + $0x1], 1 }
 0x9de   :  { %1828 = vsyncpa [#allocation9], 1 }
 0x9df   :  { %1829 = vsyncpa [#allocation12], 1 }
 0x9e0   :  { %1830 = vsyncpa [#allocation4], 1 }
 0x9e1   :  { %1832 = vsyncpa [#allocation4 + $0x1], 1 }

// kernel: tpu_custom_call.1
= control target key start
LH: loop header
LB: loop body
LE: loop exit
PB: predicated region body
PF: predicated region fallthrough
CT: control target
= control target key end

     0   :  { %s3106_s0 = inlined_call_operand.hbm [shape: f32[16,32], index: 0, kind: input, shape index: {}]   ;;  %s3107_s1 = inlined_call_operand.hbm [shape: f32[16,32], index: 1, kind: input, shape index: {}]   ;;  %s3108_s2 = inlined_call_operand.hbm [shape: f32[32,32], index: 2, kind: input, shape index: {}]   ;;  %s3109_s3 = inlined_call_operand.vmem [shape: f32[1,32], index: 3, kind: input, shape index: {}]   ;;  %s3110_s4 = inlined_call_operand.hbm [shape: f32[32,32], index: 4, kind: input, shape index: {}]   ;;  %s3111_s5 = inlined_call_operand.vmem [shape: f32[1,32], index: 5, kind: input, shape index: {}]   ;;  %s3112_s6 = inlined_call_operand.hbm [shape: f32[32,32], index: 6, kind: input, shape index: {}]   ;;  %s3113_s7 = inlined_call_operand.vmem [shape: f32[1,32], index: 7, kind: input, shape index: {}]   ;;  %s3114_s8 = inlined_call_operand.hbm [shape: f32[32,32], index: 8, kind: input, shape index: {}]   ;;  %s3115_s9 = inlined_call_operand.vmem [shape: f32[1,32], index: 9, kind: input, shape index: {}]   ;;  %s3116_s10 = inlined_call_operand.vmem [shape: f32[1,32], index: 10, kind: input, shape index: {}]   ;;  %s3117_s11 = inlined_call_operand.vmem [shape: f32[1,32], index: 11, kind: input, shape index: {}]   ;;  %s3118_s12 = inlined_call_operand.vmem [shape: f32[32,32], index: 12, kind: input, shape index: {}]   ;;  %s3119_s13 = inlined_call_operand.vmem [shape: f32[1,32], index: 13, kind: input, shape index: {}]   ;;  %s3120_s14 = inlined_call_operand.vmem [shape: f32[1,32], index: 14, kind: input, shape index: {}]   ;;  %s3121_s15 = inlined_call_operand.vmem [shape: f32[1,32], index: 15, kind: input, shape index: {}]   ;;  %s3122_s16 = inlined_call_operand.hbm [shape: f32[16,32], index: 16, kind: output, shape index: {}]  }
   0x1   :  { %3131 = sst [smem:[#allocation22_spill]] %s3106_s0 }
   0x2   :  { %3132 = sst [smem:[#allocation23_spill]] %s3108_s2 }
   0x3   :  { %3133 = sst [smem:[#allocation24_spill]] %s3110_s4 }
   0x4   :  { %3134 = sst [smem:[#allocation25_spill]] %s3112_s6 }
   0x5   :  { %3135 = sst [smem:[#allocation26_spill]] %s3114_s8 }
   0x6   :  { %3136 = sst [smem:[#allocation27_spill]] %s3116_s10 }
   0x7   :  { %3137 = sst [smem:[#allocation28_spill]] %s3117_s11 }
   0x8   :  { %3138 = sst [smem:[#allocation29_spill]] %s3118_s12 }
   0x9   :  { %3139 = sst [smem:[#allocation30_spill]] %s3119_s13 }
   0xa   :  { %3140 = sst [smem:[#allocation31_spill]] %s3120_s14 }
   0xb   :  { %3141 = sst [smem:[#allocation32_spill]] %s3121_s15 }
   0xc   :  { %3142 = sst [smem:[#allocation33_spill]] %s3122_s16 }
   0xd   :  { %21 = vsyncpa [#allocation3], 0 }
   0xe   :  { %23 = vsyncpa [#allocation3 + $0x1], 0 }
   0xf   :  { %24 = vsyncpa [#allocation6], 0 }
  0x10   :  { %26 = vsyncpa [#allocation6 + $0x1], 0 }
  0x11   :  { %27 = vsyncpa [#allocation9], 0 }
  0x12   :  { %28 = vsyncpa [#allocation12], 0 }
  0x13   :  { %29 = vsyncpa [#allocation4], 0 }
  0x14   :  { %31 = vsyncpa [#allocation4 + $0x1], 0  ;;  %s2632_s21 = smov 0   ;;  %s2634_s22 = smov 0  }
  0x15   :  { %s2636_s23 = smov 0   ;;  %s2638_s24 = smov 0  }
  0x16 LB: > { %3143 = sst [smem:[#allocation20_spill]] %s2523_s23  ;;  %s2529_s25 = smov [#allocation7]   ;;  %s2527_s24 = sphi %s2638_s24, %s3181_s24   ;;  %s2523_s23 = sphi %s2636_s23, %s3178_s23   ;;  %s2519_s22 = sphi %s2634_s22, %s3180_s22   ;;  %s2515_s21 = sphi %s2632_s21, %s3179_s21  }
  0x17   : > { %s426_s26 = sshll.u32 %s2529_s25, 4  ;;  %s2653_s27 = sadd.s32 4294967295, %s2527_s24   ;;  %s2658_s26 = int_to_ptr.vmem [resolvable:$true] %s426_s26 }
  0x18   : > { %p1936_p0 = scmp.ge.s32.totalorder %s2527_s24, 1  ;;  %p3126_p1 = scmp.eq.s32.totalorder %s2653_s27, 0 }
  0x19   : > { %p414_p2 = scmp.lt.s32.totalorder %s2527_s24, 3  ;;  %s2530_s29 = smov [#allocation8]  }
  0x1a   : > { %s442_s30 = sshll.u32 %s2530_s29, 4  ;;  %s2531_s17 = smov [#allocation10]   ;;  %s2673_s30 = int_to_ptr.vmem [resolvable:$true] %s442_s30 }
  0x1b   : > { %p2660_p3 = pnand %p1936_p0, %p414_p2  ;;  %s458_s18 = sshll.u32 %s2531_s17, 4  ;;  %s2675_s18 = int_to_ptr.vmem [resolvable:$true] %s458_s18 }
  0x1c   : > { %s3146_s2 = sld [smem:[#allocation23_spill]] }
  0x1d   : > { %s3144_s28 = scalar_select %p2660_p3, 1, 0 }
  0x1e   : > { %p2172_p5 = pneg %p2660_p3 }
  0x20   : > { %p2669_p6 = pnand %p2172_p5, %p3126_p1 }
  0x22   : > { %s2273_s25 = scalar_lea.hbm %s3146_s2, 512  ;;  %p2685_p8 = pneg %p2669_p6 }
  0x23   : > { %p2274_p7 = scmp.ne.s32.totalorder %s3146_s2, %s2273_s25  ;;  %p2280_p11 = scmp.lt.u32.totalorder %s2273_s25, %s3146_s2 }
  0x25   : > { %p2276_p9 = pnand %p2685_p8, %p2274_p7 }
  0x27   : > { %p2277_p10 = pneg %p2276_p9 }
  0x29   : > { %p2282_p12 = pnand %p2280_p11, %p2277_p10 }
  0x2b   : > { %2285 = shalt.err (!%p2282_p12)
}
  0x2c   : > { %s2286_s15 = scalar_lea.vmem %s2658_s26, 512  ;;  %p2294_p5 = scmp.lt.s32.totalorder %s2658_s26, %s2658_s26 }
  0x2d   : > { %p2287_p13 = scmp.ne.s32.totalorder %s2658_s26, %s2286_s15  ;;  %p2295_p4 = scmp.lt.s32.totalorder %s2286_s15, %s2286_s15 }
  0x2f   : > { %p2289_p0 = pnand %p2287_p13, %p2685_p8  ;;  %p2296_p7 = por %p2295_p4, %p2294_p5 }
  0x31   : > { %p2290_p2 = pneg %p2289_p0 }
  0x33   : > { %p2297_p9 = pnand %p2296_p7, %p2290_p2 }
  0x35   : > { %2300 = shalt.err (!%p2297_p9)
}
  0x36   : > { %s2532_s16 = smov 128   ;;  %s2533_s14 = smov 8  }
  0x37   : > { %2175 = dma.hbm_to_vmem [thread:$0]  (!%p2669_p6), %s3146_s2, 512, %s2658_s26, [#allocation6], %s2532_s16, %s2532_s16, %s2533_s14  }
  0x38   : > { %s3148_s4 = sld [smem:[#allocation24_spill]] }
  0x3e   : > { %s2301_s15 = scalar_lea.hbm %s3148_s4, 512 }
  0x3f   : > { %p2302_p4 = scmp.ne.s32.totalorder %s3148_s4, %s2301_s15  ;;  %p2308_p12 = scmp.lt.u32.totalorder %s2301_s15, %s3148_s4 }
  0x41   : > { %p2304_p10 = pnand %p2302_p4, %p2685_p8 }
  0x43   : > { %p2305_p11 = pneg %p2304_p10 }
  0x45   : > { %p2310_p13 = pnand %p2308_p12, %p2305_p11 }
  0x47   : > { %2313 = shalt.err (!%p2310_p13)
}
  0x48   : > { %s2314_s26 = scalar_lea.vmem %s2673_s30, 512  ;;  %p2322_p7 = scmp.lt.s32.totalorder %s2673_s30, %s2673_s30 }
  0x49   : > { %p2315_p0 = scmp.ne.s32.totalorder %s2673_s30, %s2314_s26  ;;  %p2323_p9 = scmp.lt.s32.totalorder %s2314_s26, %s2314_s26 }
  0x4b   : > { %p2317_p2 = pnand %p2315_p0, %p2685_p8  ;;  %p2324_p4 = por %p2323_p9, %p2322_p7 }
  0x4d   : > { %p2318_p5 = pneg %p2317_p2 }
  0x4f   : > { %p2325_p10 = pnand %p2324_p4, %p2318_p5 }
  0x51   : > { %2328 = shalt.err (!%p2325_p10)
}
  0x52   : > { %2178 = dma.hbm_to_vmem [thread:$0]  (!%p2669_p6), %s3148_s4, 512, %s2673_s30, [#allocation9], %s2532_s16, %s2532_s16, %s2533_s14  }
  0x53   : > { %s3149_s6 = sld [smem:[#allocation25_spill]] }
  0x59   : > { %s2329_s19 = scalar_lea.hbm %s3149_s6, 512 }
  0x5a   : > { %p2330_p11 = scmp.ne.s32.totalorder %s3149_s6, %s2329_s19  ;;  %p2336_p0 = scmp.lt.u32.totalorder %s2329_s19, %s3149_s6 }
  0x5c   : > { %p2332_p12 = pnand %p2330_p11, %p2685_p8 }
  0x5e   : > { %p2333_p13 = pneg %p2332_p12 }
  0x60   : > { %p2338_p2 = pnand %p2336_p0, %p2333_p13 }
  0x62   : > { %2341 = shalt.err (!%p2338_p2)
}
  0x63   : > { %s2342_s30 = scalar_lea.vmem %s2675_s18, 512  ;;  %p2350_p4 = scmp.lt.s32.totalorder %s2675_s18, %s2675_s18 }
  0x64   : > { %p2343_p5 = scmp.ne.s32.totalorder %s2675_s18, %s2342_s30  ;;  %p2351_p10 = scmp.lt.s32.totalorder %s2342_s30, %s2342_s30 }
  0x66   : > { %p2345_p7 = pnand %p2343_p5, %p2685_p8  ;;  %p2352_p11 = por %p2351_p10, %p2350_p4 }
  0x68   : > { %p2346_p9 = pneg %p2345_p7 }
  0x6a   : > { %p2353_p12 = pnand %p2352_p11, %p2346_p9 }
  0x6c   : > { %2356 = shalt.err (!%p2353_p12)
}
  0x6d   : > { %2181 = dma.hbm_to_vmem [thread:$0]  (!%p2669_p6), %s3149_s6, 512, %s2675_s18, [#allocation9], %s2532_s16, %s2532_s16, %s2533_s14  }
  0x6e   : > { %s2534_s11 = smov [#allocation11]   ;;  %s3150_s8 = sld [smem:[#allocation26_spill]] }
  0x6f   : > { %s474_s12 = sshll.u32 %s2534_s11, 4  ;;  %s475_s12 = int_to_ptr.vmem [resolvable:$true] %s474_s12 }
  0x74   : > { %s2357_s20 = scalar_lea.hbm %s3150_s8, 512 }
  0x75   : > { %p2358_p13 = scmp.ne.s32.totalorder %s3150_s8, %s2357_s20  ;;  %p2364_p5 = scmp.lt.u32.totalorder %s2357_s20, %s3150_s8 }
  0x77   : > { %p2360_p0 = pnand %p2358_p13, %p2685_p8 }
  0x79   : > { %p2361_p2 = pneg %p2360_p0 }
  0x7b   : > { %p2366_p7 = pnand %p2364_p5, %p2361_p2 }
  0x7d   : > { %2369 = shalt.err (!%p2366_p7)
}
  0x7e   : > { %s2370_s18 = scalar_lea.vmem %s475_s12, 512  ;;  %p2378_p11 = scmp.lt.s32.totalorder %s475_s12, %s475_s12 }
  0x7f   : > { %p2371_p9 = scmp.ne.s32.totalorder %s475_s12, %s2370_s18  ;;  %p2379_p12 = scmp.lt.s32.totalorder %s2370_s18, %s2370_s18 }
  0x81   : > { %p2373_p4 = pnand %p2371_p9, %p2685_p8  ;;  %p2380_p1 = por %p2379_p12, %p2378_p11 }
  0x83   : > { %p2374_p10 = pneg %p2373_p4 }
  0x85   : > { %p2381_p3 = pnand %p2380_p1, %p2374_p10 }
  0x87   : > { %2384 = shalt.err (!%p2381_p3)
}
  0x88   : > { %2184 = dma.hbm_to_vmem [thread:$0]  (!%p2669_p6), %s3150_s8, 512, %s475_s12, [#allocation12], %s2532_s16, %s2532_s16, %s2533_s14  }
  0x89   : > { %s1935_s0 = sadd.s32 4294967294, %s2527_s24   ;;  %s2784_s29 = sadd.s32 1, %s2527_s24  }
  0x8a   : > { %s41_s11 = ssub.s32 %s2527_s24, %s2784_s29  ;;  %s44_s13 = sadd.s32 1, %s2523_s23 }
  0x8b   : > { %p42_p1 = scmp.eq.s32.totalorder %s41_s11, 0  ;;  %p51_p3 = scmp.ne.s32.totalorder %s2523_s23, %s2519_s22 }
  0x8c   : > { %p52_p8 = scmp.eq.s32.totalorder %s2527_s24, 0  ;;  %p57_p13 = scmp.ne.s32.totalorder %s2519_s22, %s2515_s21 }
  0x8d   : > { %s2795_s19 = scalar_select %p42_p1, %s2523_s23, %s44_s13  }
  0x8e   : > { %p2797_p0 = por %p52_p8, %p51_p3  ;;  %p3153_p2 = scmp.eq.s32.totalorder %s2653_s27, 0 }
  0x8f   : > { %3151 = sst [smem:[#allocation21_spill]] %s2795_s19  ;;  %p401_p5 = scmp.eq.s32.totalorder %s2653_s27, 1 }
  0x90   : > { %p2803_p6 = por %p3153_p2, %p57_p13  ;;  %p407_p7 = scmp.eq.s32.totalorder %s1935_s0, 1 }
  0x91   : > { %p2200_p9 = scmp.lt.s32.totalorder %s2527_s24, 2  ;;  %s509_s14 = sand.u32 1, %s2523_s23  }
  0x92   : > { %s3154_s16 = scalar_select %p2803_p6, 1, 0 }
  0x93   : > { %p2810_p4 = por %p401_p5, %p51_p3  ;;  %p2814_p10 = por %p407_p7, %p57_p13 }
  0x94   : > { %s2818_s17 = sshll.u32 %s509_s14, 3  ;;  %s1943_s15 = sshll.u32 %s2527_s24, 7 }
  0x95   : > { %s3155_s12 = scalar_select %p2810_p4, 1, 0 }
  0x96   : > { %s3156_s25 = scalar_select %p2814_p10, 1, 0 }
  0x97   : > { %s3157_s26 = sld [smem:[#allocation22_spill]]  ;;  %s513_s0 = scalar_lea.vmem [#allocation2], %s2818_s17 }
  0x98   : > { %s520_s11 = sshll.u32 %s513_s0, 4  ;;  %p2831_p11 = pnand %p2200_p9, %p2797_p0  ;;  %s2827_s11 = int_to_ptr.vmem [resolvable:$true] %s520_s11 }
  0x99   : > { %s2838_s30 = scalar_lea.hbm %s3107_s1, %s1943_s15  ;;  %s527_s18 = sand.u32 1, %s2527_s24  }
  0x9a   : > { %s510_s6 = scalar_lea.sflag [#allocation3], %s509_s14  ;;  %p2387_p1 = pneg %p2831_p11 }
  0x9d   : > { %s2824_s10 = scalar_lea.hbm %s3157_s26, %s1943_s15  ;;  %s2390_s19 = scalar_lea.hbm %s3157_s26, 256 }
  0x9e   : > { %s2385_s8 = scalar_lea.hbm %s2824_s10, 128  ;;  %p2391_p13 = scmp.lt.u32.totalorder %s2824_s10, %s3157_s26 }
  0x9f   : > { %p2386_p12 = scmp.ne.s32.totalorder %s2824_s10, %s2385_s8  ;;  %p2392_p0 = scmp.lt.u32.totalorder %s2390_s19, %s2385_s8 }
  0xa0   : > { %p2394_p5 = scmp.lt.u32.totalorder %s2385_s8, %s2824_s10 }
  0xa1   : > { %p2388_p3 = pnand %p2387_p1, %p2386_p12  ;;  %p2393_p2 = por %p2392_p0, %p2391_p13 }
  0xa3   : > { %p2389_p8 = pneg %p2388_p3  ;;  %p2395_p7 = por %p2394_p5, %p2393_p2 }
  0xa5   : > { %p2396_p9 = pnand %p2395_p7, %p2389_p8 }
  0xa7   : > { %2399 = shalt.err (!%p2396_p9)
}
  0xa8   : > { %s2400_s4 = scalar_lea.vmem %s2827_s11, 128  ;;  %s2535_s14 = smov [#allocation2]  }
  0xa9   : > { %p2401_p12 = scmp.ne.s32.totalorder %s2827_s11, %s2400_s4  ;;  %s2405_s15 = sshll.u32 %s2535_s14, 4  ;;  %s2406_s15 = int_to_ptr.vmem [resolvable:$false] %s2405_s15 }
  0xaa   : > { %s2407_s23 = scalar_lea.vmem %s2406_s15, 256  ;;  %p2408_p4 = scmp.lt.s32.totalorder %s2827_s11, %s2406_s15 }
  0xab   : > { %p2403_p3 = pnand %p2401_p12, %p2387_p1  ;;  %p2409_p13 = scmp.lt.s32.totalorder %s2407_s23, %s2400_s4 }
  0xad   : > { %p2404_p10 = pneg %p2403_p3  ;;  %p2410_p0 = por %p2409_p13, %p2408_p4 }
  0xaf   : > { %p2411_p2 = pnand %p2410_p0, %p2404_p10 }
  0xb1   : > { %2414 = shalt.err (!%p2411_p2)
}
  0xb2   : > { %2188 = dma.hbm_to_vmem [thread:$0]  (!%p2831_p11), %s2824_s10, 128, %s2827_s11, %s510_s6  }
  0xb3   : > { %s531_s8 = scalar_lea.vmem [#allocation5], %s2818_s17  ;;  %s528_s20 = scalar_lea.sflag [#allocation6], %s527_s18 }
  0xb4   : > { %s538_s19 = sshll.u32 %s531_s8, 4  ;;  %s2415_s0 = scalar_lea.hbm %s2838_s30, 128  ;;  %s539_s19 = int_to_ptr.vmem [resolvable:$true] %s538_s19 }
  0xb5   : > { %p2416_p4 = scmp.ne.s32.totalorder %s2838_s30, %s2415_s0  ;;  %s2420_s14 = scalar_lea.hbm %s3107_s1, 256 }
  0xb6   : > { %p2421_p5 = scmp.lt.u32.totalorder %s2838_s30, %s3107_s1  ;;  %p2422_p7 = scmp.lt.u32.totalorder %s2420_s14, %s2415_s0 }
  0xb7   : > { %p2418_p10 = pnand %p2416_p4, %p2387_p1  ;;  %p2424_p12 = scmp.lt.u32.totalorder %s2415_s0, %s2838_s30 }
  0xb8   : > { %p2423_p9 = por %p2422_p7, %p2421_p5 }
  0xb9   : > { %p2419_p8 = pneg %p2418_p10 }
  0xba   : > { %p2425_p3 = por %p2424_p12, %p2423_p9 }
  0xbc   : > { %p2426_p13 = pnand %p2425_p3, %p2419_p8 }
  0xbe   : > { %2429 = shalt.err (!%p2426_p13)
}
  0xbf   : > { %s2430_s6 = scalar_lea.vmem %s539_s19, 128  ;;  %s2536_s17 = smov [#allocation5]  }
  0xc0   : > { %p2431_p0 = scmp.ne.s32.totalorder %s539_s19, %s2430_s6  ;;  %s2435_s10 = sshll.u32 %s2536_s17, 4  ;;  %s2436_s10 = int_to_ptr.vmem [resolvable:$false] %s2435_s10 }
  0xc1   : > { %s2437_s11 = scalar_lea.vmem %s2436_s10, 256  ;;  %p2438_p10 = scmp.lt.s32.totalorder %s539_s19, %s2436_s10 }
  0xc2   : > { %p2433_p2 = pnand %p2431_p0, %p2387_p1  ;;  %p2439_p6 = scmp.lt.s32.totalorder %s2437_s11, %s2430_s6 }
  0xc4   : > { %p2434_p4 = pneg %p2433_p2  ;;  %p2440_p5 = por %p2439_p6, %p2438_p10 }
  0xc6   : > { %p2441_p7 = pnand %p2440_p5, %p2434_p4 }
  0xc8   : > { %2444 = shalt.err (!%p2441_p7)
}
  0xc9   : > { %2191 = dma.hbm_to_vmem [thread:$0]  (!%p2831_p11), %s2838_s30, 128, %s539_s19, %s528_s20  }
  0xca   : > { %p3159_p8 = scmp.ne.s32.totalorder %s3144_s28, 0 }
  0xcb   : > { %s2891_s18 = sand.u32 (!%p3159_p8), 1, %s2519_s22   ;;  %p3160_p6 = scmp.ne.s32.totalorder (!%p3159_p8), %s3154_s16, 0 }
  0xcc   : > { %547 = sbr.rel (%p3159_p8) target bundleno = 2506 (0x9ca), region = 84  ;;  %s2894_s8 = sshll.u32 (!%p3159_p8), %s2891_s18, 3 }
  0xcd   : > { %s550_s0 = scalar_lea.sflag (!%p3159_p8), [#allocation3], %s2891_s18  ;;  %s553_s2 = scalar_lea.vmem (!%p3159_p8), [#allocation2], %s2894_s8 }
  0xd3   : > { %2490 = dma.done.wait (%p3160_p6), %s550_s0, 128  }
  0xd4   : > { %2492 = vsyncadd (%p3160_p6), %s550_s0, 4294967168  ;;  %s558_s28 = sand.u32 1, %s2653_s27   ;;  %s562_s30 = scalar_lea.vmem [#allocation5], %s2894_s8 }
  0xd5   : > { %s559_s13 = scalar_lea.sflag [#allocation6], %s558_s28 }
  0xd6   : > { %2494 = dma.done.wait (%p3160_p6), %s559_s13, 128  }
  0xd7   : > { %2496 = vsyncadd (%p3160_p6), %s559_s13, 4294967168  ;;  %p3161_p11 = scmp.eq.s32.totalorder %s2653_s27, 0 }
  0xd9   : > { %2498 = dma.done.wait (%p3161_p11), [#allocation6], 512   ;;  %p3162_p1 = pmov %p3161_p11 }
  0xdb   : > { %2500 = vsyncadd (%p3162_p1), [#allocation6], 4294966784  ;;  %p3163_p9 = pmov %p3162_p1 }
  0xdc   : > { %p3164_p12 = pmov %p3162_p1 }
  0xdd   : > { %2502 = dma.done.wait (%p3163_p9), [#allocation9], 1024  }
  0xde   : > { %2504 = vsyncadd (%p3164_p12), [#allocation9], 4294966272  ;;  %p3165_p3 = pmov %p3162_p1 }
  0xdf   : > { %p3166_p13 = pmov %p3162_p1 }
  0xe0   : > { %2506 = dma.done.wait (%p3165_p3), [#allocation12], 512  }
  0xe1   : > { %2508 = vsyncadd (%p3166_p13), [#allocation12], 4294966784  ;;  %v2537_v0 = vmov 0.0|0.0   ;;  %vm2538_vm0 = vmmov 0   ;;  %v2539_v1 = vmov 0.0   ;;  %v720_v2 = vld [vmem:[#allocation8] sm:$0xff] }
  0xe2   : > { %2126 = vmatprep.subr.bf16.mxu1 %v2537_v0  ;;  %2120 = vmatprep.subr.bf16.mxu0 %v2537_v0  ;;  %v721_v3 = vld [vmem:[#allocation8 + $0x8] sm:$0xff]  ;;  %v634_v4 = vld [vmem:[#allocation7] sm:$0xff]  ;;  %v722_v7 = vld [vmem:[#allocation8 + $0x10] sm:$0xff]  ;;  %vm645_vm1 = vcmask 261120   ;;  %vm885_vm2 = vcmask 64512   ;;  %s2540_s14 = smov 112  }
  0xe3   : > { %2044 = vmatprep.mubr.msk.f32.mxu1 %vm2538_vm0, %v2539_v1  ;;  %2033 = vmatprep.mubr.msk.f32.mxu0 %vm2538_vm0, %v2539_v1  ;;  %v2127_v5 = vpack.c.bf16 %v721_v3, %v720_v2  ;;  %v635_v6 = vld [vmem:[#allocation7 + $0x8] sm:$0xff]  ;;  %v723_v8 = vld [vmem:[#allocation8 + $0x18] sm:$0xff]  ;;  %v636_v10 = vld [vmem:[#allocation7 + $0x10] sm:$0xff]  ;;  %s2541_s15 = smov 120   ;;  %s2542_s23 = smov 104   ;;  %vm1555_vm3 = vcmask 130048  }
  0xe4   : > { %v2121_v9 = vpack.c.bf16 %v635_v6, %v634_v4  ;;  %v637_v11 = vld [vmem:[#allocation7 + $0x18] sm:$0xff]  ;;  %v2130_v12 = vpack.c.bf16 %v723_v8, %v722_v7  ;;  %v2932_v15 = vld [vmem:[%s553_s2] sm:$0xff]  ;;  %v806_v18 = vld [vmem:[#allocation10 + $0x10] sm:$0xff]  ;;  %s2543_s10 = smov 8   ;;  %s2544_s11 = smov 16   ;;  %vm1557_vm4 = vcmask 195584  }
  0xe5   : > { %2128 = vmatpush3.bf16.msra.mxu1 %v2127_v5  ;;  %v2124_v13 = vpack.c.bf16 %v637_v11, %v636_v10  ;;  %v633_v14 = vld [vmem:[%s562_s30] sm:$0xff]  ;;  %v804_v16 = vld [vmem:[#allocation10] sm:$0xff]  ;;  %v805_v17 = vld [vmem:[#allocation10 + $0x8] sm:$0xff]  ;;  %s2545_s0 = smov 24   ;;  %s3167_s16 = sld [smem:[#allocation29_spill]] }
  0xe6   : > { %2122 = vmatpush3.bf16.msra.mxu0 %v2121_v9  ;;  %2129 = vmatprep.subr.bf16.mxu1 %v2537_v0  ;;  %v2133_v19 = vpack.c.bf16 %v805_v17, %v804_v16  ;;  %v807_v20 = vld [vmem:[#allocation10 + $0x18] sm:$0xff]  ;;  %v1956_v22 = vld [vmem:[%s3111_s5] ss:$0 sm:$0xff]  ;;  %s3169_s2 = sld [smem:[#allocation28_spill]]  ;;  %s3170_s30 = sld [smem:[#allocation30_spill]] }
  0xe7   : > { %2123 = vmatprep.subr.bf16.mxu0 %v2537_v0  ;;  %v2136_v21 = vpack.c.bf16 %v807_v20, %v806_v18  ;;  %v1954_v23 = vld [vmem:[%s3109_s3] ss:$0 sm:$0xff]  ;;  %s3171_s4 = sld [smem:[#allocation31_spill]]  ;;  %s1981_s6 = sshll.u32 %s2653_s27, 7 }
  0xe8   : > { %v1958_v31 = vld [vmem:[%s3113_s7] ss:$0 sm:$0xff]  ;;  %s631_s17 = scalar_lea.vmem [#allocation13], %s2894_s8  ;;  %s1791_s13 = scalar_lea.sflag [#allocation4], %s2891_s18 }
  0xe9   : > { %2131 = vmatpush3.bf16.msra.mxu1 %v2130_v12  ;;  %p3174_p2 = scmp.ne.s32.totalorder %s3155_s12, 0  ;;  %s2546_s27 = smov [#allocation13]  }
  0xea   : > { %2125 = vmatpush3.bf16.msra.mxu0 %v2124_v13  ;;  %2058 = vmatprep.subr.mxu1 %v2539_v1  ;;  %s2449_s8 = sshll.u32 %s2546_s27, 4  ;;  %s2450_s8 = int_to_ptr.vmem [resolvable:$false] %s2449_s8 }
  0xeb   : > { %2132 = vmatprep.subr.bf16.mxu0 %v2537_v0  ;;  %s2451_s19 = scalar_lea.vmem %s2450_s8, 256 }
  0xec   : > { %2045 = vmatmul.mubr.msk.f32.vlgmr.msra.gmra.mrb[0].mxu1 %vm645_vm1, %v633_v14 }
  0xed   : > { %2034 = vmatmul.mubr.msk.f32.vlgmr.msra.gmra.mrb[0].mxu0 %vm645_vm1, %v2932_v15  ;;  %2060 = vmatprep.mubr.msk.f32.mxu1 %vm2538_vm0, %v2539_v1 }
  0xee   : > { %2055 = vmatprep.mubr.msk.f32.mxu0 %vm2538_vm0, %v2539_v1  ;;  %2134 = vmatpush3.bf16.msra.mxu0 %v2133_v19 }
  0xef   : > { %2135 = vmatprep.subr.bf16.mxu0 %v2537_v0 }
  0xf2   : > { %2137 = vmatpush3.bf16.msra.mxu0 %v2136_v21 }
  0xf3   : > { %2068 = vmatprep.subr.mxu0 %v2539_v1 }
  0xf5   : > { %2056 = vmatmul.mubr.msk.f32.vlgmr.msra.gmra.mrb[2].mxu0 %vm645_vm1, %v633_v14 }
  0xf6   : > { %2070 = vmatprep.mubr.msk.f32.mxu0 %vm2538_vm0, %v2539_v1 }
 0x1bf   : > { %v800_v24 = vpop.f32.mrb[0].mxu1 }
 0x1c0   : > { %v801_v25 = vadd.f32 %v1956_v22, %v800_v24  ;;  %v715_v26 = vpop.f32.mrb[0].mxu0  ;;  %v2046_v27 = vpop.f32.mrb[1].mxu1 }
 0x1c1   : > { %v716_v28 = vadd.f32 %v1954_v23, %v715_v26  ;;  %v2035_v29 = vpop.f32.mrb[1].mxu0 }
 0x1c2   : > { %1214 = vrot.lane.b32.xlu1 %v801_v25, %s2540_s14  ;;  %1048 = vrot.lane.b32.xlu0 %v801_v25, %s2541_s15  ;;  %v1559_v29 = vld [vmem:[#allocation11] sm:$0xff] }
 0x1c3   : > { %v719_v30 = vmul.f32 0.35355338, %v716_v28  ;;  %2059 = vmatpush3.xpose.msk.msra.mxu1 %vm885_vm2, %v801_v25 }
 0x1c4   : > { %2063 = vmatprep.subr.mxu1 %v2539_v1 }
 0x1c6   : > { %2061 = vmatmul.mubr.msk.f32.vlgmr.msra.gmra.mrb[2].mxu1 %vm885_vm2, %v719_v30  ;;  %1212 = vrot.lane.b32.xlu1 %v719_v30, %s2540_s14 }
 0x1c7   : > { %1046 = vrot.lane.b32.xlu0 %v719_v30, %s2541_s15  ;;  %2065 = vmatprep.mubr.msk.f32.mxu1 %vm2538_vm0, %v2539_v1 }
 0x1c8   : > { %v881_v32 = vpop.f32.mrb[2].mxu0 }
 0x1c9   : > { %v2968_v33 = vadd.f32 %v1958_v31, %v881_v32  ;;  %v2057_v34 = vpop.f32.mrb[3].mxu0  ;;  %v1561_v32 = vld [vmem:[#allocation11 + $0x10] sm:$0xff] }
 0x1ca   : > { %1377 = vrot.lane.b32.xlu1 %v719_v30, %s2542_s23  ;;  %v1560_v30 = vld [vmem:[#allocation11 + $0x8] sm:$0xff] }
 0x1cb   : > { %1379 = vrot.lane.b32.xlu0 %v801_v25, %s2542_s23  ;;  %2064 = vmatpush3.msra.mxu1 %v2968_v33  ;;  %v2139_v31 = vpack.c.bf16 %v1560_v30, %v1559_v29 }
 0x1cc   : > { %2073 = vmatprep.subr.mxu1 %v2539_v1 }
 0x234   : > { %v1049_v35 = vpop.permute.xlu0 %1048  ;;  %v1215_v36 = vpop.permute.xlu1 %1214 }
 0x235   : > { %2069 = vmatpush3.xpose.msk.msra.mxu0 %vm885_vm2, %v1049_v35 }
 0x236   : > { %2078 = vmatprep.subr.mxu0 %v2539_v1 }
 0x238   : > { %v1213_v38 = vpop.permute.xlu1 %1212 }
 0x239   : > { %v1047_v37 = vpop.permute.xlu0 %1046 }
 0x23a   : > { %2071 = vmatmul.mubr.msk.f32.vlgmr.msra.gmra.mrb[4].mxu0 %vm885_vm2, %v1047_v37 }
 0x23b   : > { %2079 = vmatpush3.xpose.msk.msra.mxu0 %vm885_vm2, %v1215_v36  ;;  %2080 = vmatprep.mubr.msk.f32.mxu0 %vm2538_vm0, %v2539_v1 }
 0x23c   : > { %2088 = vmatprep.subr.mxu0 %v2539_v1  ;;  %v1378_v40 = vpop.permute.xlu1 %1377 }
 0x23d   : > { %v1380_v39 = vpop.permute.xlu0 %1379 }
 0x23e   : > { %2081 = vmatmul.mubr.msk.f32.vlgmr.msra.gmra.mrb[6].mxu0 %vm885_vm2, %v1213_v38 }
 0x23f   : > { %2089 = vmatpush3.xpose.msk.msra.mxu0 %vm885_vm2, %v1380_v39  ;;  %2090 = vmatprep.mubr.msk.f32.mxu0 %vm2538_vm0, %v2539_v1 }
 0x240   : > { %2138 = vmatprep.subr.bf16.mxu0 %v2537_v0 }
 0x242   : > { %2091 = vmatmul.mubr.msk.f32.vlgmr.msra.gmra.mrb[8].mxu0 %vm885_vm2, %v1378_v40 }
 0x243   : > { %2106 = vmatprep.mubr.msk.f32.mxu0 %vm2538_vm0, %v2539_v1  ;;  %2140 = vmatpush3.bf16.msra.mxu0 %v2139_v31 }
 0x244   : > { %2141 = vmatprep.subr.bf16.mxu0 %v2537_v0 }
 0x299   : > { %v958_v41 = vpop.f32.mrb[2].mxu1 }
 0x29a   : > { %v2062_v42 = vpop.f32.mrb[3].mxu1  ;;  %v962_v43 = vsel %vm885_vm2, %v958_v41, -inf }
 0x29b   : > { %963 = vmax.xlane.f32.xlu0 %v962_v43 }
 0x30d   : > { %v1120_v44 = vpop.f32.mrb[4].mxu0 }
 0x30e   : > { %v2072_v45 = vpop.f32.mrb[5].mxu0  ;;  %v1124_v46 = vsel %vm885_vm2, %v1120_v44, -inf }
 0x30f   : > { %1125 = vmax.xlane.f32.xlu1 %v1124_v46  ;;  %v1972_v46 = vld [vmem:[%s3115_s9] ss:$0 sm:$0xff] }
 0x311   : > { %v1286_v47 = vpop.f32.mrb[6].mxu0 }
 0x312   : > { %v2082_v48 = vpop.f32.mrb[7].mxu0  ;;  %v1290_v49 = vsel %vm885_vm2, %v1286_v47, -inf }
 0x313   : > { %1291 = vmax.xlane.f32.xlu0 %v1290_v49 }
 0x315   : > { %v1451_v50 = vpop.f32.mrb[8].mxu0 }
 0x316   : > { %v2092_v51 = vpop.f32.mrb[9].mxu0  ;;  %v1455_v52 = vsel %vm885_vm2, %v1451_v50, -inf }
 0x317   : > { %1456 = vmax.xlane.f32.xlu0 %v1455_v52 }
 0x320   : > { %1136 = vrot.lane.b32.xlu1 %v2968_v33, %s2541_s15 }
 0x328   : > { %v964_v53 = vpop.xlane.xlu0 %963 }
 0x329   : > { %v965_v54 = vsub.f32 %v958_v41, %v964_v53 }
 0x32b   : > { %v966_v55 = vmul.f32 1.442695, %v965_v54 }
 0x32d   : > { %2253 = vpow2.f32 %v966_v55 }
 0x337   : > { %v2254_v56 = vpop.eup %2253 }
 0x338   : > { %v968_v57 = vsel %vm885_vm2, %v2254_v56, 0.0 }
 0x344   : > { %969 = vadd.xlane.f32.xlu1 %v968_v57  ;;  %v1674_v57 = vld [vmem:[%s3167_s16] sm:$0xff] }
 0x39c   : > { %v1126_v58 = vpop.xlane.xlu1 %1125 }
 0x39d   : > { %v1127_v59 = vsub.f32 %v1120_v44, %v1126_v58  ;;  %v1675_v58 = vld [vmem:[%s3167_s16 + $0x8] sm:$0xff] }
 0x39f   : > { %v1128_v60 = vmul.f32 1.442695, %v1127_v59  ;;  %v2145_v59 = vpack.c.bf16 %v1675_v58, %v1674_v57 }
 0x3a0   : > { %v1292_v61 = vpop.xlane.xlu0 %1291  ;;  %v1137_v11 = vpop.permute.xlu1 %1136 }
 0x3a1   : > { %2255 = vpow2.f32 %v1128_v60  ;;  %v1293_v62 = vsub.f32 %v1286_v47, %v1292_v61  ;;  %v1677_v60 = vld [vmem:[%s3167_s16 + $0x18] sm:$0xff] }
 0x3a3   : > { %v1294_v63 = vmul.f32 1.442695, %v1293_v62 }
 0x3a4   : > { %v1457_v2 = vpop.xlane.xlu0 %1456 }
 0x3a5   : > { %2257 = vpow2.f32 %v1294_v63  ;;  %v1458_v3 = vsub.f32 %v1451_v50, %v1457_v2 }
 0x3a7   : > { %v1459_v4 = vmul.f32 1.442695, %v1458_v3 }
 0x3a9   : > { %2259 = vpow2.f32 %v1459_v4 }
 0x3ab   : > { %v2256_v5 = vpop.eup %2255 }
 0x3ac   : > { %v1130_v6 = vsel %vm885_vm2, %v2256_v5, 0.0 }
 0x3ad   : > { %1131 = vadd.xlane.f32.xlu0 %v1130_v6 }
 0x3af   : > { %v2258_v7 = vpop.eup %2257 }
 0x3b0   : > { %v1296_v8 = vsel %vm885_vm2, %v2258_v7, 0.0 }
 0x3b1   : > { %1297 = vadd.xlane.f32.xlu1 %v1296_v8  ;;  %v1976_v8 = vld [vmem:[%s3170_s30] ss:$0 sm:$0xff] }
 0x3b3   : > { %v2260_v9 = vpop.eup %2259 }
 0x3b4   : > { %v1461_v10 = vsel %vm885_vm2, %v2260_v9, 0.0 }
 0x3b5   : > { %1462 = vadd.xlane.f32.xlu0 %v1461_v10 }
 0x3c2   : > { %1466 = vrot.lane.b32.xlu1 %v2968_v33, %s2542_s23  ;;  %s3172_s23 = sld [smem:[#allocation32_spill]] }
 0x3cb   : > { %1301 = vrot.lane.b32.xlu0 %v2968_v33, %s2540_s14  ;;  %v1562_v33 = vld [vmem:[#allocation11 + $0x18] sm:$0xff] }
 0x3cc   : > { %v2142_v34 = vpack.c.bf16 %v1562_v33, %v1561_v32 }
 0x3ce   : > { %2143 = vmatpush3.bf16.msra.mxu0 %v2142_v34 }
 0x3d1   : > { %v970_v12 = vpop.xlane.xlu1 %969 }
 0x3d2   : > { %2261 = vrcp.f32 %v970_v12 }
 0x3dc   : > { %v2262_v13 = vpop.eup %2261 }
 0x3dd   : > { %v972_v14 = vmul.f32 %v2262_v13, %v2254_v56 }
 0x3df   : > { %2066 = vmatmul.mubr.msk.f32.vlgmr.msra.gmra.mrb[4].mxu1 %vm885_vm2, %v972_v14 }
 0x3e0   : > { %2074 = vmatpush3.msra.mxu1 %v1137_v11  ;;  %2075 = vmatprep.mubr.msk.f32.mxu1 %vm2538_vm0, %v2539_v1 }
 0x3e1   : > { %2083 = vmatprep.subr.mxu1 %v2539_v1 }
 0x43a   : > { %v1132_v16 = vpop.xlane.xlu0 %1131 }
 0x43b   : > { %2263 = vrcp.f32 %v1132_v16 }
 0x43e   : > { %v1298_v17 = vpop.xlane.xlu1 %1297 }
 0x43f   : > { %2265 = vrcp.f32 %v1298_v17 }
 0x442   : > { %v1463_v18 = vpop.xlane.xlu0 %1462  ;;  %v1467_v24 = vpop.permute.xlu1 %1466 }
 0x443   : > { %2267 = vrcp.f32 %v1463_v18 }
 0x445   : > { %v2264_v19 = vpop.eup %2263 }
 0x446   : > { %v1134_v20 = vmul.f32 %v2264_v19, %v2256_v5  ;;  %v1302_v21 = vpop.permute.xlu0 %1301  ;;  %v1975_v5 = vld [vmem:[%s3169_s2] ss:$0 sm:$0xff]  ;;  %s3173_s2 = sld [smem:[#allocation33_spill]] }
 0x448   : > { %2076 = vmatmul.mubr.msk.f32.vlgmr.msra.gmra.mrb[6].mxu1 %vm885_vm2, %v1134_v20 }
 0x449   : > { %v2266_v22 = vpop.eup %2265  ;;  %2084 = vmatpush3.msra.mxu1 %v1302_v21  ;;  %2085 = vmatprep.mubr.msk.f32.mxu1 %vm2538_vm0, %v2539_v1 }
 0x44a   : > { %v1300_v23 = vmul.f32 %v2266_v22, %v2258_v7  ;;  %2093 = vmatprep.subr.mxu1 %v2539_v1 }
 0x44c   : > { %2086 = vmatmul.mubr.msk.f32.vlgmr.msra.gmra.mrb[8].mxu1 %vm885_vm2, %v1300_v23  ;;  %s3061_s28 = scalar_lea.hbm %s3173_s2, %s1981_s6 }
 0x44d   : > { %v2268_v25 = vpop.eup %2267  ;;  %2094 = vmatpush3.msra.mxu1 %v1467_v24  ;;  %2095 = vmatprep.mubr.msk.f32.mxu1 %vm2538_vm0, %v2539_v1 }
 0x44e   : > { %v1465_v26 = vmul.f32 %v2268_v25, %v2260_v9  ;;  %2144 = vmatprep.subr.bf16.mxu1 %v2537_v0  ;;  %v1978_v25 = vld [vmem:[%s3171_s4] ss:$0 sm:$0xff] }
 0x450   : > { %2096 = vmatmul.mubr.msk.f32.vlgmr.msra.gmra.mrb[10].mxu1 %vm885_vm2, %v1465_v26 }
 0x451   : > { %2117 = vmatprep.mubr.msk.f32.mxu1 %vm2538_vm0, %v2539_v1  ;;  %2146 = vmatpush3.bf16.msra.mxu1 %v2145_v59 }
 0x452   : > { %2147 = vmatprep.subr.bf16.mxu1 %v2537_v0 }
 0x4b2   : > { %v1042_v27 = vpop.f32.mrb[4].mxu1 }
 0x4b3   : > { %v2067_v28 = vpop.f32.mrb[5].mxu1 }
 0x51b   : > { %v1208_v35 = vpop.f32.mrb[6].mxu1 }
 0x51c   : > { %1543 = vrot.lane.b32.xlu1 %v1208_v35, %s2543_s10  ;;  %v2077_v36 = vpop.f32.mrb[7].mxu1  ;;  %s3168_s10 = sld [smem:[#allocation27_spill]] }
 0x51f   : > { %v1373_v37 = vpop.f32.mrb[8].mxu1 }
 0x520   : > { %1547 = vrot.lane.b32.xlu0 %v1373_v37, %s2544_s11  ;;  %v2087_v1 = vpop.f32.mrb[9].mxu1 }
 0x522   : > { %v1974_v4 = vld [vmem:[%s3168_s10] ss:$0 sm:$0xff]  ;;  %s1804_s10 = sshll.u32 %s631_s17, 4  ;;  %s3063_s10 = int_to_ptr.vmem [resolvable:$true] %s1804_s10 }
 0x523   : > { %v1538_v38 = vpop.f32.mrb[10].mxu1  ;;  %s2445_s30 = scalar_lea.vmem %s3063_s10, 128  ;;  %p2452_p5 = scmp.lt.s32.totalorder %s3063_s10, %s2450_s8 }
 0x524   : > { %1551 = vrot.lane.b32.xlu1 %v1538_v38, %s2545_s0  ;;  %v2097_v39 = vpop.f32.mrb[11].mxu1  ;;  %p2446_p0 = scmp.ne.s32.totalorder %s3063_s10, %s2445_s30  ;;  %p2453_p7 = scmp.lt.s32.totalorder %s2451_s19, %s2445_s30 }
 0x526   : > { %p2447_p4 = pnand %p2446_p0, %p3174_p2  ;;  %p2454_p8 = por %p2453_p7, %p2452_p5 }
 0x528   : > { %p2448_p10 = pneg %p2447_p4 }
 0x52a   : > { %p2455_p6 = pnand %p2454_p8, %p2448_p10 }
 0x58e   : > { %v1544_v40 = vpop.permute.xlu1 %1543 }
 0x58f   : > { %v1554_v42 = vsel %vm885_vm2, %v1042_v27, %v1544_v40  ;;  %v1979_v27 = vld [vmem:[%s3172_s23] ss:$0 sm:$0xff] }
 0x592   : > { %v1548_v41 = vpop.permute.xlu0 %1547 }
 0x593   : > { %v1556_v43 = vsel %vm1555_vm3, %v1554_v42, %v1548_v41 }
 0x596   : > { %v1552_v44 = vpop.permute.xlu1 %1551 }
 0x597   : > { %v1558_v45 = vsel %vm1557_vm4, %v1556_v43, %v1552_v44 }
 0x598   : > { %2107 = vmatmul.mubr.msk.f32.vlgmr.msra.gmra.mrb[10].mxu0 %vm645_vm1, %v1558_v45 }
 0x66b   : > { %v1639_v47 = vpop.f32.mrb[10].mxu0 }
 0x66c   : > { %v1640_v48 = vadd.f32 %v1972_v46, %v1639_v47  ;;  %v2108_v49 = vpop.f32.mrb[11].mxu0 }
 0x66e   : > { %v1643_v50 = vadd.f32 %v1640_v48, %v2932_v15  ;;  %v1676_v15 = vld [vmem:[%s3167_s16 + $0x10] sm:$0xff] }
 0x66f   : > { %v2148_v61 = vpack.c.bf16 %v1677_v60, %v1676_v15 }
 0x670   : > { %v1646_v51 = vsel %vm645_vm1, %v1643_v50, 0.0 }
 0x671   : > { %1647 = vadd.xlane.f32.xlu0 %v1646_v51  ;;  %2149 = vmatpush3.bf16.msra.mxu1 %v2148_v61 }
 0x6fe   : > { %v1648_v52 = vpop.xlane.xlu0 %1647 }
 0x6ff   : > { %v1650_v53 = vmul.f32 0.03125, %v1648_v52 }
 0x701   : > { %v1651_v54 = vsub.f32 %v1643_v50, %v1650_v53 }
 0x703   : > { %v1652_v55 = vmul.f32 %v1651_v54, %v1651_v54 }
 0x705   : > { %v1653_v56 = vsel %vm645_vm1, %v1652_v55, 0.0 }
 0x706   : > { %1654 = vadd.xlane.f32.xlu1 %v1653_v56 }
 0x793   : > { %v1655_v62 = vpop.xlane.xlu1 %1654 }
 0x794   : > { %v1656_v63 = vmul.f32 0.03125, %v1655_v62 }
 0x796   : > { %v1657_v2 = vadd.f32 1e-05, %v1656_v63 }
 0x798   : > { %2269 = vrsqrt.f32 %v1657_v2 }
 0x7a2   : > { %v2270_v3 = vpop.eup %2269 }
 0x7a3   : > { %v1659_v0 = vmul.f32 %v2270_v3, %v1651_v54 }
 0x7a5   : > { %v1666_v6 = vmul.f32 %v1974_v4, %v1659_v0 }
 0x7a7   : > { %v1673_v7 = vadd.f32 %v1975_v5, %v1666_v6 }
 0x7a9   : > { %2118 = vmatmul.mubr.msk.f32.vlgmr.msra.gmra.mrb[12].mxu1 %vm645_vm1, %v1673_v7 }
 0x87c   : > { %v1754_v9 = vpop.f32.mrb[12].mxu1 }
 0x87d   : > { %v1755_v10 = vadd.f32 %v1976_v8, %v1754_v9  ;;  %v2119_v11 = vpop.f32.mrb[13].mxu1 }
 0x87f   : > { %v1758_v12 = vmax.f32 %v1755_v10, 0.0 }
 0x881   : > { %v1759_v13 = vadd.f32 %v1758_v12, %v1673_v7 }
 0x883   : > { %v1762_v14 = vsel %vm645_vm1, %v1759_v13, 0.0 }
 0x884   : > { %1763 = vadd.xlane.f32.xlu0 %v1762_v14 }
 0x911   : > { %v1764_v16 = vpop.xlane.xlu0 %1763 }
 0x912   : > { %v1765_v17 = vmul.f32 0.03125, %v1764_v16 }
 0x914   : > { %v1766_v18 = vsub.f32 %v1759_v13, %v1765_v17 }
 0x916   : > { %v1767_v19 = vmul.f32 %v1766_v18, %v1766_v18 }
 0x918   : > { %v1768_v20 = vsel %vm645_vm1, %v1767_v19, 0.0 }
 0x919   : > { %1769 = vadd.xlane.f32.xlu0 %v1768_v20 }
 0x9a6   : > { %v1770_v21 = vpop.xlane.xlu0 %1769 }
 0x9a7   : > { %v1771_v22 = vmul.f32 0.03125, %v1770_v21 }
 0x9a9   : > { %v1772_v23 = vadd.f32 1e-05, %v1771_v22 }
 0x9ab   : > { %2271 = vrsqrt.f32 %v1772_v23 }
 0x9b5   : > { %v2272_v24 = vpop.eup %2271 }
 0x9b6   : > { %v1774_v26 = vmul.f32 %v2272_v24, %v1766_v18 }
 0x9b8   : > { %v1781_v28 = vmul.f32 %v1978_v25, %v1774_v26 }
 0x9ba   : > { %v1788_v29 = vadd.f32 %v1979_v27, %v1781_v28 }
 0x9bc   : > { %1789 = vst.msk [vmem:[%s631_s17] sm:$0xff] %vm645_vm1, %v1788_v29 }
 0x9bd   : > { %2458 = shalt.err (!%p2455_p6)
}
 0x9be   : > { %s2459_s18 = scalar_lea.hbm %s3061_s28, 128  ;;  %s2463_s14 = scalar_lea.hbm %s3173_s2, 256 }
 0x9bf   : > { %p2460_p11 = scmp.ne.s32.totalorder %s3061_s28, %s2459_s18  ;;  %p2464_p12 = scmp.lt.u32.totalorder %s3061_s28, %s3173_s2 }
 0x9c0   : > { %p2465_p3 = scmp.lt.u32.totalorder %s2463_s14, %s2459_s18  ;;  %p2467_p0 = scmp.lt.u32.totalorder %s2459_s18, %s3061_s28 }
 0x9c1   : > { %p2461_p1 = pnand %p2460_p11, %p3174_p2 }
 0x9c2   : > { %p2466_p13 = por %p2465_p3, %p2464_p12 }
 0x9c3   : > { %p2462_p9 = pneg %p2461_p1 }
 0x9c4   : > { %p2468_p4 = por %p2467_p0, %p2466_p13 }
 0x9c6   : > { %p2469_p10 = pnand %p2468_p4, %p2462_p9 }
 0x9c8   : > { %2472 = shalt.err (!%p2469_p10)
}
 0x9c9   : > { %2170 = dma.vmem_to_hbm [thread:$0]  (%p3174_p2), %s3063_s10, 128, %s3061_s28, %s1791_s13  }
 0x9ca PF: > { %s1816_s6 = sand.u32 1, %s2515_s21   ;;  %p3175_p5 = scmp.ne.s32.totalorder %s3156_s25, 0 }
 0x9cb   : > { %p3176_p7 = scmp.ge.s32.totalorder %s2527_s24, 2  ;;  %s1817_s17 = scalar_lea.sflag [#allocation4], %s1816_s6 }
 0x9cd   : > { %p2193_p8 = pnand %p3176_p7, %p3175_p5 }
 0x9cf   : > { %2510 = dma.done.wait (!%p2193_p8), %s1817_s17, 128  }
 0x9d0   : > { %2512 = vsyncadd (!%p2193_p8), %s1817_s17, 4294967168  ;;  %s3177_s11 = sld [smem:[#allocation20_spill]]  ;;  %s3178_s23 = sld [smem:[#allocation21_spill]] }
 0x9d1   : > { %p34_p6 = scmp.ge.s32.totalorder %s2784_s29, 4   ;;  %s3179_s21 = smov %s2519_s22 }
 0x9d2   : > { %s3181_s24 = smov %s2784_s29 }
 0x9d3   :  { %36 = sbr.rel (!%p34_p6) target bundleno = 22 (0x16), region = 158 }
 0x9d6   : > { %s3180_s22 = smov %s3177_s11 }
 0x9da   :  { %1822 = vsyncpa [#allocation3], 1 }
 0x9db   :  { %1824 = vsyncpa [#allocation3 + $0x1], 1 }
 0x9dc   :  { %1825 = vsyncpa [#allocation6], 1 }
 0x9dd   :  { %1827 = vsyncpa [#allocation6 + $0x1], 1 }
 0x9de   :  { %1828 = vsyncpa [#allocation9], 1 }
 0x9df   :  { %1829 = vsyncpa [#allocation12], 1 }
 0x9e0   :  { %1830 = vsyncpa [#allocation4], 1 }
 0x9e1   :  { %1832 = vsyncpa [#allocation4 + $0x1], 1 }

</bundles_post_ra>
